<compile_context>
chip_gen: v6e
topology: v6e:2x2x1
jax: 0.10.0
libtpu: 0.0.40
codegen_flags: <defaults>
</compile_context>

<pallas_src>
import functools

import jax
import jax.numpy as jnp
import numpy as np
from jax import lax
from jax.experimental import pallas as pl
from jax.experimental.pallas import tpu as pltpu


# ---------------------------------------------------------------------------
# Fused LSTM + MLP-head kernel (single invocation, everything resident in VMEM)
# ---------------------------------------------------------------------------
def _forecaster_kernel(x_ref, wih_ref, b_ref, whh_ref,
                       w1_ref, b1_ref, w2_ref, b2_ref, w3_ref, b3_ref,
                       out_ref,
                       xpi, xpf, xpg, xpo, hseq, *, seq_len):
    N, H = hseq.shape           # N = T * Bp
    Bp = N // seq_len

    # ---- 1. Hoisted input projection, per gate: (N, I) x (I, H) + bias, four times.
    #        Done once for all time steps; writes straight into per-gate VMEM slabs so
    #        the serial loop never slices lanes inside a vreg.
    x2 = x_ref[...]                                                     # (N, I)
    xpi[...] = jnp.dot(x2, wih_ref[0], preferred_element_type=jnp.float32) + b_ref[0]
    xpf[...] = jnp.dot(x2, wih_ref[1], preferred_element_type=jnp.float32) + b_ref[1]
    xpg[...] = jnp.dot(x2, wih_ref[2], preferred_element_type=jnp.float32) + b_ref[2]
    xpo[...] = jnp.dot(x2, wih_ref[3], preferred_element_type=jnp.float32) + b_ref[3]

    # Per-gate, pre-transposed recurrent weights; loaded once outside the loop.
    whh_i = whh_ref[0]
    whh_f = whh_ref[1]
    whh_g = whh_ref[2]
    whh_o = whh_ref[3]

    # ---- 2. Sequential recurrence: only h @ W_hh_k + gate math on the critical path.
    def step(t, carry):
        h, c = carry
        row = pl.ds(pl.multiple_of(t * Bp, Bp), Bp)                    # sublane-aligned
        i_g = jax.nn.sigmoid(xpi[row, :] +
                             jnp.dot(h, whh_i, preferred_element_type=jnp.float32))
        f_g = jax.nn.sigmoid(xpf[row, :] +
                             jnp.dot(h, whh_f, preferred_element_type=jnp.float32))
        g_g = jnp.tanh(xpg[row, :] +
                       jnp.dot(h, whh_g, preferred_element_type=jnp.float32))
        o_g = jax.nn.sigmoid(xpo[row, :] +
                             jnp.dot(h, whh_o, preferred_element_type=jnp.float32))
        c_new = f_g * c + i_g * g_g
        h_new = o_g * jnp.tanh(c_new)
        hseq[row, :] = h_new
        return (h_new, c_new)

    h0 = jnp.zeros((Bp, H), jnp.float32)
    c0 = jnp.zeros((Bp, H), jnp.float32)
    lax.fori_loop(0, seq_len, step, (h0, c0), unroll=seq_len <= 16)

    # ---- 3. Fused MLP head on the whole hidden slab (one pass, no HBM round-trip).
    hs = hseq[...]                                                     # (N, H)
    y = jnp.dot(hs, w1_ref[...], preferred_element_type=jnp.float32) + b1_ref[...]
    y = jnp.maximum(y, 0.0)                                            # (N, 128)
    y = jnp.dot(y, w2_ref[...], preferred_element_type=jnp.float32) + b2_ref[...]
    y = jnp.maximum(y, 0.0)                                            # (N, 64)
    # Final FC written lane-dense as (1, N): contract w3 (1,64) with y (N,64) on dim 1.
    out = lax.dot_general(w3_ref[...], y, (((1,), (1,)), ((), ())),
                          preferred_element_type=jnp.float32) + b3_ref[...]
    out_ref[...] = out                                                 # (1, N)


# ---------------------------------------------------------------------------
# Wrapper: layout plumbing (padding, pre-transposes, per-gate splits) in plain JAX/XLA.
# ---------------------------------------------------------------------------
def forecaster_forward(x, params):
    # x: (T, B, I) time-major (PyTorch nn.LSTM default, batch_first=False)
    T, B, I = x.shape
    H = params["w_hh"].shape[1]
    Bp = ((B + 7) // 8) * 8                  # pad batch to full sublane groups
    N = T * Bp

    x_p = jnp.pad(x, ((0, 0), (0, Bp - B), (0, 0)))
    x2d = x_p.reshape(N, I)

    # Per-gate pre-transposed weights (gate order i, f, g, o — PyTorch convention).
    wih_g = params["w_ih"].reshape(4, H, I).transpose(0, 2, 1)    # (4, I, H)
    whh_g = params["w_hh"].reshape(4, H, H).transpose(0, 2, 1)    # (4, H, H)
    b_g = params["b_lstm"].reshape(4, 1, H)                       # (4, 1, H)
    w1_t = params["w1"].T                                         # (H, 128)
    w2_t = params["w2"].T                                         # (128, 64)

    vmem = pl.BlockSpec(memory_space=pltpu.MemorySpace.VMEM)
    out_row = pl.pallas_call(
        functools.partial(_forecaster_kernel, seq_len=T),
        out_shape=jax.ShapeDtypeStruct((1, N), jnp.float32),
        in_specs=[vmem] * 10,
        out_specs=vmem,
        scratch_shapes=[pltpu.VMEM((N, H), jnp.float32)] * 5,     # xpi, xpf, xpg, xpo, hseq
    )(x2d, wih_g, b_g, whh_g,
      w1_t, params["b1"], w2_t, params["b2"], params["w3"], params["b3"])

    # (1, T*Bp) -> (T, Bp) -> drop batch padding -> (T, B, 1)
    return out_row.reshape(T, Bp)[:, :B, None]


# ---------------------------------------------------------------------------
# Pure-JAX reference (matches PyTorch semantics) and parameter init.
# ---------------------------------------------------------------------------
def forecaster_reference(x, params):
    T, B, I = x.shape
    H = params["w_hh"].shape[1]
    w_ih, w_hh, b = params["w_ih"], params["w_hh"], params["b_lstm"][0]

    def step(carry, x_t):
        h, c = carry
        gates = x_t @ w_ih.T + h @ w_hh.T + b
        i_g = jax.nn.sigmoid(gates[:, 0 * H:1 * H])
        f_g = jax.nn.sigmoid(gates[:, 1 * H:2 * H])
        g_g = jnp.tanh(gates[:, 2 * H:3 * H])
        o_g = jax.nn.sigmoid(gates[:, 3 * H:4 * H])
        c = f_g * c + i_g * g_g
        h = o_g * jnp.tanh(c)
        return (h, c), h

    init = (jnp.zeros((B, H), jnp.float32), jnp.zeros((B, H), jnp.float32))
    _, h_seq = jax.lax.scan(step, init, x)
    y = jnp.maximum(h_seq @ params["w1"].T + params["b1"][0], 0.0)
    y = jnp.maximum(y @ params["w2"].T + params["b2"][0], 0.0)
    y = y @ params["w3"].T + params["b3"][0]
    return y


def init_params(key, input_size, hidden_size):
    ks = jax.random.split(key, 10)

    def unif(k, shape, fan):
        bound = 1.0 / np.sqrt(fan)
        return jax.random.uniform(k, shape, jnp.float32, -bound, bound)

    H = hidden_size
    w_ih = unif(ks[0], (4 * H, input_size), H)
    w_hh = unif(ks[1], (4 * H, H), H)
    b_ih = unif(ks[2], (4 * H,), H)
    b_hh = unif(ks[3], (4 * H,), H)
    w1 = unif(ks[4], (128, H), H)
    b1 = unif(ks[5], (128,), H)
    w2 = unif(ks[6], (64, 128), 128)
    b2 = unif(ks[7], (64,), 128)
    w3 = unif(ks[8], (1, 64), 64)
    b3 = unif(ks[9], (1,), 64)
    return {
        "w_ih": w_ih, "w_hh": w_hh,
        "b_lstm": (b_ih + b_hh).reshape(1, 4 * H),
        "w1": w1, "b1": b1.reshape(1, 128),
        "w2": w2, "b2": b2.reshape(1, 64),
        "w3": w3, "b3": b3.reshape(1, 1),
    }


if __name__ == "__main__":
    T, B, INPUT_SIZE, HIDDEN_SIZE = 8, 2, 4, 32

    key = jax.random.PRNGKey(0)
    k_x, k_p = jax.random.split(key)
    x = jax.random.normal(k_x, (T, B, INPUT_SIZE), dtype=jnp.float32)
    params = init_params(k_p, INPUT_SIZE, HIDDEN_SIZE)

    out = forecaster_forward(x, params)
    out = jax.block_until_ready(out)

    ref = forecaster_reference(x, params)
    np.testing.assert_allclose(np.asarray(out), np.asarray(ref), rtol=1e-5, atol=1e-5)

    print("KERNEL_OK")
</pallas_src>

<mosaic_0001>
module attributes {stable_mosaic.version = 11 : i64} {
  func.func @_forecaster_kernel(%arg0: memref<64x4xf32, #tpu.memory_space<vmem>>, %arg1: memref<4x4x32xf32, #tpu.memory_space<vmem>>, %arg2: memref<4x1x32xf32, #tpu.memory_space<vmem>>, %arg3: memref<4x32x32xf32, #tpu.memory_space<vmem>>, %arg4: memref<32x128xf32, #tpu.memory_space<vmem>>, %arg5: memref<1x128xf32, #tpu.memory_space<vmem>>, %arg6: memref<128x64xf32, #tpu.memory_space<vmem>>, %arg7: memref<1x64xf32, #tpu.memory_space<vmem>>, %arg8: memref<1x64xf32, #tpu.memory_space<vmem>>, %arg9: memref<1x1xf32, #tpu.memory_space<vmem>>, %arg10: memref<1x64xf32, #tpu.memory_space<vmem>>, %arg11: memref<64x32xf32, #tpu.memory_space<vmem>>, %arg12: memref<64x32xf32, #tpu.memory_space<vmem>>, %arg13: memref<64x32xf32, #tpu.memory_space<vmem>>, %arg14: memref<64x32xf32, #tpu.memory_space<vmem>>, %arg15: memref<64x32xf32, #tpu.memory_space<vmem>>) attributes {dimension_semantics = [], scalar_prefetch = 0 : i64, scratch_operands = 5 : i64, tpu.core_type = #tpu.core_type<tc>} {
    %c0 = arith.constant 0 : index
    %c0_0 = arith.constant 0 : index
    %0 = vector.load %arg0[%c0, %c0_0] : memref<64x4xf32, #tpu.memory_space<vmem>>, vector<64x4xf32>
    %c0_1 = arith.constant 0 : index
    %c0_2 = arith.constant 0 : index
    %c0_3 = arith.constant 0 : index
    %1 = vector.load %arg1[%c0_1, %c0_2, %c0_3] : memref<4x4x32xf32, #tpu.memory_space<vmem>>, vector<1x4x32xf32>
    %2 = vector.shape_cast %1 : vector<1x4x32xf32> to vector<4x32xf32>
    %cst = arith.constant dense<0.000000e+00> : vector<64x32xf32>
    %3 = tpu.matmul %0, %2, %cst {dimension_numbers = #tpu.dot_dimension_numbers<[1], [0], [0], [1], [0, 0, 1, 1], [], []>} : vector<64x4xf32>, vector<4x32xf32>, vector<64x32xf32> -> vector<64x32xf32>
    %c0_4 = arith.constant 0 : index
    %c0_5 = arith.constant 0 : index
    %c0_6 = arith.constant 0 : index
    %4 = vector.load %arg2[%c0_4, %c0_5, %c0_6] : memref<4x1x32xf32, #tpu.memory_space<vmem>>, vector<1x1x32xf32>
    %5 = vector.shape_cast %4 : vector<1x1x32xf32> to vector<1x32xf32>
    %6 = vector.broadcast %5 : vector<1x32xf32> to vector<64x32xf32>
    %7 = arith.addf %3, %6 : vector<64x32xf32>
    %c0_7 = arith.constant 0 : index
    %c0_8 = arith.constant 0 : index
    %8 = vector.load %arg11[%c0_7, %c0_8] : memref<64x32xf32, #tpu.memory_space<vmem>>, vector<64x32xf32>
    tpu.vector_store %arg11[%c0_7, %c0_8], %7 {strides = array<i32>} : memref<64x32xf32, #tpu.memory_space<vmem>>, vector<64x32xf32>,
    %c1 = arith.constant 1 : index
    %c0_9 = arith.constant 0 : index
    %c0_10 = arith.constant 0 : index
    %9 = vector.load %arg1[%c1, %c0_9, %c0_10] : memref<4x4x32xf32, #tpu.memory_space<vmem>>, vector<1x4x32xf32>
    %10 = vector.shape_cast %9 : vector<1x4x32xf32> to vector<4x32xf32>
    %cst_11 = arith.constant dense<0.000000e+00> : vector<64x32xf32>
    %11 = tpu.matmul %0, %10, %cst_11 {dimension_numbers = #tpu.dot_dimension_numbers<[1], [0], [0], [1], [0, 0, 1, 1], [], []>} : vector<64x4xf32>, vector<4x32xf32>, vector<64x32xf32> -> vector<64x32xf32>
    %c1_12 = arith.constant 1 : index
    %c0_13 = arith.constant 0 : index
    %c0_14 = arith.constant 0 : index
    %12 = vector.load %arg2[%c1_12, %c0_13, %c0_14] : memref<4x1x32xf32, #tpu.memory_space<vmem>>, vector<1x1x32xf32>
    %13 = vector.shape_cast %12 : vector<1x1x32xf32> to vector<1x32xf32>
    %14 = vector.broadcast %13 : vector<1x32xf32> to vector<64x32xf32>
    %15 = arith.addf %11, %14 : vector<64x32xf32>
    %c0_15 = arith.constant 0 : index
    %c0_16 = arith.constant 0 : index
    %16 = vector.load %arg12[%c0_15, %c0_16] : memref<64x32xf32, #tpu.memory_space<vmem>>, vector<64x32xf32>
    tpu.vector_store %arg12[%c0_15, %c0_16], %15 {strides = array<i32>} : memref<64x32xf32, #tpu.memory_space<vmem>>, vector<64x32xf32>,
    %c2 = arith.constant 2 : index
    %c0_17 = arith.constant 0 : index
    %c0_18 = arith.constant 0 : index
    %17 = vector.load %arg1[%c2, %c0_17, %c0_18] : memref<4x4x32xf32, #tpu.memory_space<vmem>>, vector<1x4x32xf32>
    %18 = vector.shape_cast %17 : vector<1x4x32xf32> to vector<4x32xf32>
    %cst_19 = arith.constant dense<0.000000e+00> : vector<64x32xf32>
    %19 = tpu.matmul %0, %18, %cst_19 {dimension_numbers = #tpu.dot_dimension_numbers<[1], [0], [0], [1], [0, 0, 1, 1], [], []>} : vector<64x4xf32>, vector<4x32xf32>, vector<64x32xf32> -> vector<64x32xf32>
    %c2_20 = arith.constant 2 : index
    %c0_21 = arith.constant 0 : index
    %c0_22 = arith.constant 0 : index
    %20 = vector.load %arg2[%c2_20, %c0_21, %c0_22] : memref<4x1x32xf32, #tpu.memory_space<vmem>>, vector<1x1x32xf32>
    %21 = vector.shape_cast %20 : vector<1x1x32xf32> to vector<1x32xf32>
    %22 = vector.broadcast %21 : vector<1x32xf32> to vector<64x32xf32>
    %23 = arith.addf %19, %22 : vector<64x32xf32>
    %c0_23 = arith.constant 0 : index
    %c0_24 = arith.constant 0 : index
    %24 = vector.load %arg13[%c0_23, %c0_24] : memref<64x32xf32, #tpu.memory_space<vmem>>, vector<64x32xf32>
    tpu.vector_store %arg13[%c0_23, %c0_24], %23 {strides = array<i32>} : memref<64x32xf32, #tpu.memory_space<vmem>>, vector<64x32xf32>,
    %c3 = arith.constant 3 : index
    %c0_25 = arith.constant 0 : index
    %c0_26 = arith.constant 0 : index
    %25 = vector.load %arg1[%c3, %c0_25, %c0_26] : memref<4x4x32xf32, #tpu.memory_space<vmem>>, vector<1x4x32xf32>
    %26 = vector.shape_cast %25 : vector<1x4x32xf32> to vector<4x32xf32>
    %cst_27 = arith.constant dense<0.000000e+00> : vector<64x32xf32>
    %27 = tpu.matmul %0, %26, %cst_27 {dimension_numbers = #tpu.dot_dimension_numbers<[1], [0], [0], [1], [0, 0, 1, 1], [], []>} : vector<64x4xf32>, vector<4x32xf32>, vector<64x32xf32> -> vector<64x32xf32>
    %c3_28 = arith.constant 3 : index
    %c0_29 = arith.constant 0 : index
    %c0_30 = arith.constant 0 : index
    %28 = vector.load %arg2[%c3_28, %c0_29, %c0_30] : memref<4x1x32xf32, #tpu.memory_space<vmem>>, vector<1x1x32xf32>
    %29 = vector.shape_cast %28 : vector<1x1x32xf32> to vector<1x32xf32>
    %30 = vector.broadcast %29 : vector<1x32xf32> to vector<64x32xf32>
    %31 = arith.addf %27, %30 : vector<64x32xf32>
    %c0_31 = arith.constant 0 : index
    %c0_32 = arith.constant 0 : index
    %32 = vector.load %arg14[%c0_31, %c0_32] : memref<64x32xf32, #tpu.memory_space<vmem>>, vector<64x32xf32>
    tpu.vector_store %arg14[%c0_31, %c0_32], %31 {strides = array<i32>} : memref<64x32xf32, #tpu.memory_space<vmem>>, vector<64x32xf32>,
    %c0_33 = arith.constant 0 : index
    %c0_34 = arith.constant 0 : index
    %c0_35 = arith.constant 0 : index
    %33 = vector.load %arg3[%c0_33, %c0_34, %c0_35] : memref<4x32x32xf32, #tpu.memory_space<vmem>>, vector<1x32x32xf32>
    %34 = vector.shape_cast %33 : vector<1x32x32xf32> to vector<32x32xf32>
    %c1_36 = arith.constant 1 : index
    %c0_37 = arith.constant 0 : index
    %c0_38 = arith.constant 0 : index
    %35 = vector.load %arg3[%c1_36, %c0_37, %c0_38] : memref<4x32x32xf32, #tpu.memory_space<vmem>>, vector<1x32x32xf32>
    %36 = vector.shape_cast %35 : vector<1x32x32xf32> to vector<32x32xf32>
    %c2_39 = arith.constant 2 : index
    %c0_40 = arith.constant 0 : index
    %c0_41 = arith.constant 0 : index
    %37 = vector.load %arg3[%c2_39, %c0_40, %c0_41] : memref<4x32x32xf32, #tpu.memory_space<vmem>>, vector<1x32x32xf32>
    %38 = vector.shape_cast %37 : vector<1x32x32xf32> to vector<32x32xf32>
    %c3_42 = arith.constant 3 : index
    %c0_43 = arith.constant 0 : index
    %c0_44 = arith.constant 0 : index
    %39 = vector.load %arg3[%c3_42, %c0_43, %c0_44] : memref<4x32x32xf32, #tpu.memory_space<vmem>>, vector<1x32x32xf32>
    %40 = vector.shape_cast %39 : vector<1x32x32xf32> to vector<32x32xf32>
    %cst_45 = arith.constant 0.000000e+00 : f32
    %41 = vector.broadcast %cst_45 : f32 to vector<8x32xf32>
    %cst_46 = arith.constant 0.000000e+00 : f32
    %42 = vector.broadcast %cst_46 : f32 to vector<8x32xf32>
    %c0_i32 = arith.constant 0 : i32
    %c8_i32 = arith.constant 8 : i32
    %43 = arith.muli %c0_i32, %c8_i32 : i32
    %44 = tpu.assume_multiple %43, 8 : i32
    %45 = arith.index_cast %44 : i32 to index
    %c0_47 = arith.constant 0 : index
    %46 = vector.load %arg11[%45, %c0_47] : memref<64x32xf32, #tpu.memory_space<vmem>>, vector<8x32xf32>
    %cst_48 = arith.constant dense<0.000000e+00> : vector<8x32xf32>
    %47 = tpu.matmul %41, %34, %cst_48 {dimension_numbers = #tpu.dot_dimension_numbers<[1], [0], [0], [1], [0, 0, 1, 1], [], []>} : vector<8x32xf32>, vector<32x32xf32>, vector<8x32xf32> -> vector<8x32xf32>
    %48 = arith.addf %46, %47 : vector<8x32xf32>
    %49 = arith.negf %48 : vector<8x32xf32>
    %50 = math.exp %49 : vector<8x32xf32>
    %cst_49 = arith.constant 1.000000e+00 : f32
    %51 = vector.broadcast %cst_49 : f32 to vector<8x32xf32>
    %52 = arith.addf %51, %50 : vector<8x32xf32>
    %53 = arith.divf %51, %52 : vector<8x32xf32>
    %54 = arith.index_cast %44 : i32 to index
    %c0_50 = arith.constant 0 : index
    %55 = vector.load %arg12[%54, %c0_50] : memref<64x32xf32, #tpu.memory_space<vmem>>, vector<8x32xf32>
    %cst_51 = arith.constant dense<0.000000e+00> : vector<8x32xf32>
    %56 = tpu.matmul %41, %36, %cst_51 {dimension_numbers = #tpu.dot_dimension_numbers<[1], [0], [0], [1], [0, 0, 1, 1], [], []>} : vector<8x32xf32>, vector<32x32xf32>, vector<8x32xf32> -> vector<8x32xf32>
    %57 = arith.addf %55, %56 : vector<8x32xf32>
    %58 = arith.negf %57 : vector<8x32xf32>
    %59 = math.exp %58 : vector<8x32xf32>
    %cst_52 = arith.constant 1.000000e+00 : f32
    %60 = vector.broadcast %cst_52 : f32 to vector<8x32xf32>
    %61 = arith.addf %60, %59 : vector<8x32xf32>
    %62 = arith.divf %60, %61 : vector<8x32xf32>
    %63 = arith.index_cast %44 : i32 to index
    %c0_53 = arith.constant 0 : index
    %64 = vector.load %arg13[%63, %c0_53] : memref<64x32xf32, #tpu.memory_space<vmem>>, vector<8x32xf32>
    %cst_54 = arith.constant dense<0.000000e+00> : vector<8x32xf32>
    %65 = tpu.matmul %41, %38, %cst_54 {dimension_numbers = #tpu.dot_dimension_numbers<[1], [0], [0], [1], [0, 0, 1, 1], [], []>} : vector<8x32xf32>, vector<32x32xf32>, vector<8x32xf32> -> vector<8x32xf32>
    %66 = arith.addf %64, %65 : vector<8x32xf32>
    %67 = math.tanh %66 : vector<8x32xf32>
    %68 = arith.index_cast %44 : i32 to index
    %c0_55 = arith.constant 0 : index
    %69 = vector.load %arg14[%68, %c0_55] : memref<64x32xf32, #tpu.memory_space<vmem>>, vector<8x32xf32>
    %cst_56 = arith.constant dense<0.000000e+00> : vector<8x32xf32>
    %70 = tpu.matmul %41, %40, %cst_56 {dimension_numbers = #tpu.dot_dimension_numbers<[1], [0], [0], [1], [0, 0, 1, 1], [], []>} : vector<8x32xf32>, vector<32x32xf32>, vector<8x32xf32> -> vector<8x32xf32>
    %71 = arith.addf %69, %70 : vector<8x32xf32>
    %72 = arith.negf %71 : vector<8x32xf32>
    %73 = math.exp %72 : vector<8x32xf32>
    %cst_57 = arith.constant 1.000000e+00 : f32
    %74 = vector.broadcast %cst_57 : f32 to vector<8x32xf32>
    %75 = arith.addf %74, %73 : vector<8x32xf32>
    %76 = arith.divf %74, %75 : vector<8x32xf32>
    %77 = arith.mulf %62, %42 : vector<8x32xf32>
    %78 = arith.mulf %53, %67 : vector<8x32xf32>
    %79 = arith.addf %77, %78 : vector<8x32xf32>
    %80 = math.tanh %79 : vector<8x32xf32>
    %81 = arith.mulf %76, %80 : vector<8x32xf32>
    %82 = arith.index_cast %44 : i32 to index
    %c0_58 = arith.constant 0 : index
    %83 = vector.load %arg15[%82, %c0_58] : memref<64x32xf32, #tpu.memory_space<vmem>>, vector<8x32xf32>
    tpu.vector_store %arg15[%82, %c0_58], %81 {strides = array<i32>} : memref<64x32xf32, #tpu.memory_space<vmem>>, vector<8x32xf32>,
    %c1_i32 = arith.constant 1 : i32
    %c8_i32_59 = arith.constant 8 : i32
    %84 = arith.muli %c1_i32, %c8_i32_59 : i32
    %85 = tpu.assume_multiple %84, 8 : i32
    %86 = arith.index_cast %85 : i32 to index
    %c0_60 = arith.constant 0 : index
    %87 = vector.load %arg11[%86, %c0_60] : memref<64x32xf32, #tpu.memory_space<vmem>>, vector<8x32xf32>
    %cst_61 = arith.constant dense<0.000000e+00> : vector<8x32xf32>
    %88 = tpu.matmul %81, %34, %cst_61 {dimension_numbers = #tpu.dot_dimension_numbers<[1], [0], [0], [1], [0, 0, 1, 1], [], []>} : vector<8x32xf32>, vector<32x32xf32>, vector<8x32xf32> -> vector<8x32xf32>
    %89 = arith.addf %87, %88 : vector<8x32xf32>
    %90 = arith.negf %89 : vector<8x32xf32>
    %91 = math.exp %90 : vector<8x32xf32>
    %cst_62 = arith.constant 1.000000e+00 : f32
    %92 = vector.broadcast %cst_62 : f32 to vector<8x32xf32>
    %93 = arith.addf %92, %91 : vector<8x32xf32>
    %94 = arith.divf %92, %93 : vector<8x32xf32>
    %95 = arith.index_cast %85 : i32 to index
    %c0_63 = arith.constant 0 : index
    %96 = vector.load %arg12[%95, %c0_63] : memref<64x32xf32, #tpu.memory_space<vmem>>, vector<8x32xf32>
    %cst_64 = arith.constant dense<0.000000e+00> : vector<8x32xf32>
    %97 = tpu.matmul %81, %36, %cst_64 {dimension_numbers = #tpu.dot_dimension_numbers<[1], [0], [0], [1], [0, 0, 1, 1], [], []>} : vector<8x32xf32>, vector<32x32xf32>, vector<8x32xf32> -> vector<8x32xf32>
    %98 = arith.addf %96, %97 : vector<8x32xf32>
    %99 = arith.negf %98 : vector<8x32xf32>
    %100 = math.exp %99 : vector<8x32xf32>
    %cst_65 = arith.constant 1.000000e+00 : f32
    %101 = vector.broadcast %cst_65 : f32 to vector<8x32xf32>
    %102 = arith.addf %101, %100 : vector<8x32xf32>
    %103 = arith.divf %101, %102 : vector<8x32xf32>
    %104 = arith.index_cast %85 : i32 to index
    %c0_66 = arith.constant 0 : index
    %105 = vector.load %arg13[%104, %c0_66] : memref<64x32xf32, #tpu.memory_space<vmem>>, vector<8x32xf32>
    %cst_67 = arith.constant dense<0.000000e+00> : vector<8x32xf32>
    %106 = tpu.matmul %81, %38, %cst_67 {dimension_numbers = #tpu.dot_dimension_numbers<[1], [0], [0], [1], [0, 0, 1, 1], [], []>} : vector<8x32xf32>, vector<32x32xf32>, vector<8x32xf32> -> vector<8x32xf32>
    %107 = arith.addf %105, %106 : vector<8x32xf32>
    %108 = math.tanh %107 : vector<8x32xf32>
    %109 = arith.index_cast %85 : i32 to index
    %c0_68 = arith.constant 0 : index
    %110 = vector.load %arg14[%109, %c0_68] : memref<64x32xf32, #tpu.memory_space<vmem>>, vector<8x32xf32>
    %cst_69 = arith.constant dense<0.000000e+00> : vector<8x32xf32>
    %111 = tpu.matmul %81, %40, %cst_69 {dimension_numbers = #tpu.dot_dimension_numbers<[1], [0], [0], [1], [0, 0, 1, 1], [], []>} : vector<8x32xf32>, vector<32x32xf32>, vector<8x32xf32> -> vector<8x32xf32>
    %112 = arith.addf %110, %111 : vector<8x32xf32>
    %113 = arith.negf %112 : vector<8x32xf32>
    %114 = math.exp %113 : vector<8x32xf32>
    %cst_70 = arith.constant 1.000000e+00 : f32
    %115 = vector.broadcast %cst_70 : f32 to vector<8x32xf32>
    %116 = arith.addf %115, %114 : vector<8x32xf32>
    %117 = arith.divf %115, %116 : vector<8x32xf32>
    %118 = arith.mulf %103, %79 : vector<8x32xf32>
    %119 = arith.mulf %94, %108 : vector<8x32xf32>
    %120 = arith.addf %118, %119 : vector<8x32xf32>
    %121 = math.tanh %120 : vector<8x32xf32>
    %122 = arith.mulf %117, %121 : vector<8x32xf32>
    %123 = arith.index_cast %85 : i32 to index
    %c0_71 = arith.constant 0 : index
    %124 = vector.load %arg15[%123, %c0_71] : memref<64x32xf32, #tpu.memory_space<vmem>>, vector<8x32xf32>
    tpu.vector_store %arg15[%123, %c0_71], %122 {strides = array<i32>} : memref<64x32xf32, #tpu.memory_space<vmem>>, vector<8x32xf32>,
    %c2_i32 = arith.constant 2 : i32
    %c8_i32_72 = arith.constant 8 : i32
    %125 = arith.muli %c2_i32, %c8_i32_72 : i32
    %126 = tpu.assume_multiple %125, 8 : i32
    %127 = arith.index_cast %126 : i32 to index
    %c0_73 = arith.constant 0 : index
    %128 = vector.load %arg11[%127, %c0_73] : memref<64x32xf32, #tpu.memory_space<vmem>>, vector<8x32xf32>
    %cst_74 = arith.constant dense<0.000000e+00> : vector<8x32xf32>
    %129 = tpu.matmul %122, %34, %cst_74 {dimension_numbers = #tpu.dot_dimension_numbers<[1], [0], [0], [1], [0, 0, 1, 1], [], []>} : vector<8x32xf32>, vector<32x32xf32>, vector<8x32xf32> -> vector<8x32xf32>
    %130 = arith.addf %128, %129 : vector<8x32xf32>
    %131 = arith.negf %130 : vector<8x32xf32>
    %132 = math.exp %131 : vector<8x32xf32>
    %cst_75 = arith.constant 1.000000e+00 : f32
    %133 = vector.broadcast %cst_75 : f32 to vector<8x32xf32>
    %134 = arith.addf %133, %132 : vector<8x32xf32>
    %135 = arith.divf %133, %134 : vector<8x32xf32>
    %136 = arith.index_cast %126 : i32 to index
    %c0_76 = arith.constant 0 : index
    %137 = vector.load %arg12[%136, %c0_76] : memref<64x32xf32, #tpu.memory_space<vmem>>, vector<8x32xf32>
    %cst_77 = arith.constant dense<0.000000e+00> : vector<8x32xf32>
    %138 = tpu.matmul %122, %36, %cst_77 {dimension_numbers = #tpu.dot_dimension_numbers<[1], [0], [0], [1], [0, 0, 1, 1], [], []>} : vector<8x32xf32>, vector<32x32xf32>, vector<8x32xf32> -> vector<8x32xf32>
    %139 = arith.addf %137, %138 : vector<8x32xf32>
    %140 = arith.negf %139 : vector<8x32xf32>
    %141 = math.exp %140 : vector<8x32xf32>
    %cst_78 = arith.constant 1.000000e+00 : f32
    %142 = vector.broadcast %cst_78 : f32 to vector<8x32xf32>
    %143 = arith.addf %142, %141 : vector<8x32xf32>
    %144 = arith.divf %142, %143 : vector<8x32xf32>
    %145 = arith.index_cast %126 : i32 to index
    %c0_79 = arith.constant 0 : index
    %146 = vector.load %arg13[%145, %c0_79] : memref<64x32xf32, #tpu.memory_space<vmem>>, vector<8x32xf32>
    %cst_80 = arith.constant dense<0.000000e+00> : vector<8x32xf32>
    %147 = tpu.matmul %122, %38, %cst_80 {dimension_numbers = #tpu.dot_dimension_numbers<[1], [0], [0], [1], [0, 0, 1, 1], [], []>} : vector<8x32xf32>, vector<32x32xf32>, vector<8x32xf32> -> vector<8x32xf32>
    %148 = arith.addf %146, %147 : vector<8x32xf32>
    %149 = math.tanh %148 : vector<8x32xf32>
    %150 = arith.index_cast %126 : i32 to index
    %c0_81 = arith.constant 0 : index
    %151 = vector.load %arg14[%150, %c0_81] : memref<64x32xf32, #tpu.memory_space<vmem>>, vector<8x32xf32>
    %cst_82 = arith.constant dense<0.000000e+00> : vector<8x32xf32>
    %152 = tpu.matmul %122, %40, %cst_82 {dimension_numbers = #tpu.dot_dimension_numbers<[1], [0], [0], [1], [0, 0, 1, 1], [], []>} : vector<8x32xf32>, vector<32x32xf32>, vector<8x32xf32> -> vector<8x32xf32>
    %153 = arith.addf %151, %152 : vector<8x32xf32>
    %154 = arith.negf %153 : vector<8x32xf32>
    %155 = math.exp %154 : vector<8x32xf32>
    %cst_83 = arith.constant 1.000000e+00 : f32
    %156 = vector.broadcast %cst_83 : f32 to vector<8x32xf32>
    %157 = arith.addf %156, %155 : vector<8x32xf32>
    %158 = arith.divf %156, %157 : vector<8x32xf32>
    %159 = arith.mulf %144, %120 : vector<8x32xf32>
    %160 = arith.mulf %135, %149 : vector<8x32xf32>
    %161 = arith.addf %159, %160 : vector<8x32xf32>
    %162 = math.tanh %161 : vector<8x32xf32>
    %163 = arith.mulf %158, %162 : vector<8x32xf32>
    %164 = arith.index_cast %126 : i32 to index
    %c0_84 = arith.constant 0 : index
    %165 = vector.load %arg15[%164, %c0_84] : memref<64x32xf32, #tpu.memory_space<vmem>>, vector<8x32xf32>
    tpu.vector_store %arg15[%164, %c0_84], %163 {strides = array<i32>} : memref<64x32xf32, #tpu.memory_space<vmem>>, vector<8x32xf32>,
    %c3_i32 = arith.constant 3 : i32
    %c8_i32_85 = arith.constant 8 : i32
    %166 = arith.muli %c3_i32, %c8_i32_85 : i32
    %167 = tpu.assume_multiple %166, 8 : i32
    %168 = arith.index_cast %167 : i32 to index
    %c0_86 = arith.constant 0 : index
    %169 = vector.load %arg11[%168, %c0_86] : memref<64x32xf32, #tpu.memory_space<vmem>>, vector<8x32xf32>
    %cst_87 = arith.constant dense<0.000000e+00> : vector<8x32xf32>
    %170 = tpu.matmul %163, %34, %cst_87 {dimension_numbers = #tpu.dot_dimension_numbers<[1], [0], [0], [1], [0, 0, 1, 1], [], []>} : vector<8x32xf32>, vector<32x32xf32>, vector<8x32xf32> -> vector<8x32xf32>
    %171 = arith.addf %169, %170 : vector<8x32xf32>
    %172 = arith.negf %171 : vector<8x32xf32>
    %173 = math.exp %172 : vector<8x32xf32>
    %cst_88 = arith.constant 1.000000e+00 : f32
    %174 = vector.broadcast %cst_88 : f32 to vector<8x32xf32>
    %175 = arith.addf %174, %173 : vector<8x32xf32>
    %176 = arith.divf %174, %175 : vector<8x32xf32>
    %177 = arith.index_cast %167 : i32 to index
    %c0_89 = arith.constant 0 : index
    %178 = vector.load %arg12[%177, %c0_89] : memref<64x32xf32, #tpu.memory_space<vmem>>, vector<8x32xf32>
    %cst_90 = arith.constant dense<0.000000e+00> : vector<8x32xf32>
    %179 = tpu.matmul %163, %36, %cst_90 {dimension_numbers = #tpu.dot_dimension_numbers<[1], [0], [0], [1], [0, 0, 1, 1], [], []>} : vector<8x32xf32>, vector<32x32xf32>, vector<8x32xf32> -> vector<8x32xf32>
    %180 = arith.addf %178, %179 : vector<8x32xf32>
    %181 = arith.negf %180 : vector<8x32xf32>
    %182 = math.exp %181 : vector<8x32xf32>
    %cst_91 = arith.constant 1.000000e+00 : f32
    %183 = vector.broadcast %cst_91 : f32 to vector<8x32xf32>
    %184 = arith.addf %183, %182 : vector<8x32xf32>
    %185 = arith.divf %183, %184 : vector<8x32xf32>
    %186 = arith.index_cast %167 : i32 to index
    %c0_92 = arith.constant 0 : index
    %187 = vector.load %arg13[%186, %c0_92] : memref<64x32xf32, #tpu.memory_space<vmem>>, vector<8x32xf32>
    %cst_93 = arith.constant dense<0.000000e+00> : vector<8x32xf32>
    %188 = tpu.matmul %163, %38, %cst_93 {dimension_numbers = #tpu.dot_dimension_numbers<[1], [0], [0], [1], [0, 0, 1, 1], [], []>} : vector<8x32xf32>, vector<32x32xf32>, vector<8x32xf32> -> vector<8x32xf32>
    %189 = arith.addf %187, %188 : vector<8x32xf32>
    %190 = math.tanh %189 : vector<8x32xf32>
    %191 = arith.index_cast %167 : i32 to index
    %c0_94 = arith.constant 0 : index
    %192 = vector.load %arg14[%191, %c0_94] : memref<64x32xf32, #tpu.memory_space<vmem>>, vector<8x32xf32>
    %cst_95 = arith.constant dense<0.000000e+00> : vector<8x32xf32>
    %193 = tpu.matmul %163, %40, %cst_95 {dimension_numbers = #tpu.dot_dimension_numbers<[1], [0], [0], [1], [0, 0, 1, 1], [], []>} : vector<8x32xf32>, vector<32x32xf32>, vector<8x32xf32> -> vector<8x32xf32>
    %194 = arith.addf %192, %193 : vector<8x32xf32>
    %195 = arith.negf %194 : vector<8x32xf32>
    %196 = math.exp %195 : vector<8x32xf32>
    %cst_96 = arith.constant 1.000000e+00 : f32
    %197 = vector.broadcast %cst_96 : f32 to vector<8x32xf32>
    %198 = arith.addf %197, %196 : vector<8x32xf32>
    %199 = arith.divf %197, %198 : vector<8x32xf32>
    %200 = arith.mulf %185, %161 : vector<8x32xf32>
    %201 = arith.mulf %176, %190 : vector<8x32xf32>
    %202 = arith.addf %200, %201 : vector<8x32xf32>
    %203 = math.tanh %202 : vector<8x32xf32>
    %204 = arith.mulf %199, %203 : vector<8x32xf32>
    %205 = arith.index_cast %167 : i32 to index
    %c0_97 = arith.constant 0 : index
    %206 = vector.load %arg15[%205, %c0_97] : memref<64x32xf32, #tpu.memory_space<vmem>>, vector<8x32xf32>
    tpu.vector_store %arg15[%205, %c0_97], %204 {strides = array<i32>} : memref<64x32xf32, #tpu.memory_space<vmem>>, vector<8x32xf32>,
    %c4_i32 = arith.constant 4 : i32
    %c8_i32_98 = arith.constant 8 : i32
    %207 = arith.muli %c4_i32, %c8_i32_98 : i32
    %208 = tpu.assume_multiple %207, 8 : i32
    %209 = arith.index_cast %208 : i32 to index
    %c0_99 = arith.constant 0 : index
    %210 = vector.load %arg11[%209, %c0_99] : memref<64x32xf32, #tpu.memory_space<vmem>>, vector<8x32xf32>
    %cst_100 = arith.constant dense<0.000000e+00> : vector<8x32xf32>
    %211 = tpu.matmul %204, %34, %cst_100 {dimension_numbers = #tpu.dot_dimension_numbers<[1], [0], [0], [1], [0, 0, 1, 1], [], []>} : vector<8x32xf32>, vector<32x32xf32>, vector<8x32xf32> -> vector<8x32xf32>
    %212 = arith.addf %210, %211 : vector<8x32xf32>
    %213 = arith.negf %212 : vector<8x32xf32>
    %214 = math.exp %213 : vector<8x32xf32>
    %cst_101 = arith.constant 1.000000e+00 : f32
    %215 = vector.broadcast %cst_101 : f32 to vector<8x32xf32>
    %216 = arith.addf %215, %214 : vector<8x32xf32>
    %217 = arith.divf %215, %216 : vector<8x32xf32>
    %218 = arith.index_cast %208 : i32 to index
    %c0_102 = arith.constant 0 : index
    %219 = vector.load %arg12[%218, %c0_102] : memref<64x32xf32, #tpu.memory_space<vmem>>, vector<8x32xf32>
    %cst_103 = arith.constant dense<0.000000e+00> : vector<8x32xf32>
    %220 = tpu.matmul %204, %36, %cst_103 {dimension_numbers = #tpu.dot_dimension_numbers<[1], [0], [0], [1], [0, 0, 1, 1], [], []>} : vector<8x32xf32>, vector<32x32xf32>, vector<8x32xf32> -> vector<8x32xf32>
    %221 = arith.addf %219, %220 : vector<8x32xf32>
    %222 = arith.negf %221 : vector<8x32xf32>
    %223 = math.exp %222 : vector<8x32xf32>
    %cst_104 = arith.constant 1.000000e+00 : f32
    %224 = vector.broadcast %cst_104 : f32 to vector<8x32xf32>
    %225 = arith.addf %224, %223 : vector<8x32xf32>
    %226 = arith.divf %224, %225 : vector<8x32xf32>
    %227 = arith.index_cast %208 : i32 to index
    %c0_105 = arith.constant 0 : index
    %228 = vector.load %arg13[%227, %c0_105] : memref<64x32xf32, #tpu.memory_space<vmem>>, vector<8x32xf32>
    %cst_106 = arith.constant dense<0.000000e+00> : vector<8x32xf32>
    %229 = tpu.matmul %204, %38, %cst_106 {dimension_numbers = #tpu.dot_dimension_numbers<[1], [0], [0], [1], [0, 0, 1, 1], [], []>} : vector<8x32xf32>, vector<32x32xf32>, vector<8x32xf32> -> vector<8x32xf32>
    %230 = arith.addf %228, %229 : vector<8x32xf32>
    %231 = math.tanh %230 : vector<8x32xf32>
    %232 = arith.index_cast %208 : i32 to index
    %c0_107 = arith.constant 0 : index
    %233 = vector.load %arg14[%232, %c0_107] : memref<64x32xf32, #tpu.memory_space<vmem>>, vector<8x32xf32>
    %cst_108 = arith.constant dense<0.000000e+00> : vector<8x32xf32>
    %234 = tpu.matmul %204, %40, %cst_108 {dimension_numbers = #tpu.dot_dimension_numbers<[1], [0], [0], [1], [0, 0, 1, 1], [], []>} : vector<8x32xf32>, vector<32x32xf32>, vector<8x32xf32> -> vector<8x32xf32>
    %235 = arith.addf %233, %234 : vector<8x32xf32>
    %236 = arith.negf %235 : vector<8x32xf32>
    %237 = math.exp %236 : vector<8x32xf32>
    %cst_109 = arith.constant 1.000000e+00 : f32
    %238 = vector.broadcast %cst_109 : f32 to vector<8x32xf32>
    %239 = arith.addf %238, %237 : vector<8x32xf32>
    %240 = arith.divf %238, %239 : vector<8x32xf32>
    %241 = arith.mulf %226, %202 : vector<8x32xf32>
    %242 = arith.mulf %217, %231 : vector<8x32xf32>
    %243 = arith.addf %241, %242 : vector<8x32xf32>
    %244 = math.tanh %243 : vector<8x32xf32>
    %245 = arith.mulf %240, %244 : vector<8x32xf32>
    %246 = arith.index_cast %208 : i32 to index
    %c0_110 = arith.constant 0 : index
    %247 = vector.load %arg15[%246, %c0_110] : memref<64x32xf32, #tpu.memory_space<vmem>>, vector<8x32xf32>
    tpu.vector_store %arg15[%246, %c0_110], %245 {strides = array<i32>} : memref<64x32xf32, #tpu.memory_space<vmem>>, vector<8x32xf32>,
    %c5_i32 = arith.constant 5 : i32
    %c8_i32_111 = arith.constant 8 : i32
    %248 = arith.muli %c5_i32, %c8_i32_111 : i32
    %249 = tpu.assume_multiple %248, 8 : i32
    %250 = arith.index_cast %249 : i32 to index
    %c0_112 = arith.constant 0 : index
    %251 = vector.load %arg11[%250, %c0_112] : memref<64x32xf32, #tpu.memory_space<vmem>>, vector<8x32xf32>
    %cst_113 = arith.constant dense<0.000000e+00> : vector<8x32xf32>
    %252 = tpu.matmul %245, %34, %cst_113 {dimension_numbers = #tpu.dot_dimension_numbers<[1], [0], [0], [1], [0, 0, 1, 1], [], []>} : vector<8x32xf32>, vector<32x32xf32>, vector<8x32xf32> -> vector<8x32xf32>
    %253 = arith.addf %251, %252 : vector<8x32xf32>
    %254 = arith.negf %253 : vector<8x32xf32>
    %255 = math.exp %254 : vector<8x32xf32>
    %cst_114 = arith.constant 1.000000e+00 : f32
    %256 = vector.broadcast %cst_114 : f32 to vector<8x32xf32>
    %257 = arith.addf %256, %255 : vector<8x32xf32>
    %258 = arith.divf %256, %257 : vector<8x32xf32>
    %259 = arith.index_cast %249 : i32 to index
    %c0_115 = arith.constant 0 : index
    %260 = vector.load %arg12[%259, %c0_115] : memref<64x32xf32, #tpu.memory_space<vmem>>, vector<8x32xf32>
    %cst_116 = arith.constant dense<0.000000e+00> : vector<8x32xf32>
    %261 = tpu.matmul %245, %36, %cst_116 {dimension_numbers = #tpu.dot_dimension_numbers<[1], [0], [0], [1], [0, 0, 1, 1], [], []>} : vector<8x32xf32>, vector<32x32xf32>, vector<8x32xf32> -> vector<8x32xf32>
    %262 = arith.addf %260, %261 : vector<8x32xf32>
    %263 = arith.negf %262 : vector<8x32xf32>
    %264 = math.exp %263 : vector<8x32xf32>
    %cst_117 = arith.constant 1.000000e+00 : f32
    %265 = vector.broadcast %cst_117 : f32 to vector<8x32xf32>
    %266 = arith.addf %265, %264 : vector<8x32xf32>
    %267 = arith.divf %265, %266 : vector<8x32xf32>
    %268 = arith.index_cast %249 : i32 to index
    %c0_118 = arith.constant 0 : index
    %269 = vector.load %arg13[%268, %c0_118] : memref<64x32xf32, #tpu.memory_space<vmem>>, vector<8x32xf32>
    %cst_119 = arith.constant dense<0.000000e+00> : vector<8x32xf32>
    %270 = tpu.matmul %245, %38, %cst_119 {dimension_numbers = #tpu.dot_dimension_numbers<[1], [0], [0], [1], [0, 0, 1, 1], [], []>} : vector<8x32xf32>, vector<32x32xf32>, vector<8x32xf32> -> vector<8x32xf32>
    %271 = arith.addf %269, %270 : vector<8x32xf32>
    %272 = math.tanh %271 : vector<8x32xf32>
    %273 = arith.index_cast %249 : i32 to index
    %c0_120 = arith.constant 0 : index
    %274 = vector.load %arg14[%273, %c0_120] : memref<64x32xf32, #tpu.memory_space<vmem>>, vector<8x32xf32>
    %cst_121 = arith.constant dense<0.000000e+00> : vector<8x32xf32>
    %275 = tpu.matmul %245, %40, %cst_121 {dimension_numbers = #tpu.dot_dimension_numbers<[1], [0], [0], [1], [0, 0, 1, 1], [], []>} : vector<8x32xf32>, vector<32x32xf32>, vector<8x32xf32> -> vector<8x32xf32>
    %276 = arith.addf %274, %275 : vector<8x32xf32>
    %277 = arith.negf %276 : vector<8x32xf32>
    %278 = math.exp %277 : vector<8x32xf32>
    %cst_122 = arith.constant 1.000000e+00 : f32
    %279 = vector.broadcast %cst_122 : f32 to vector<8x32xf32>
    %280 = arith.addf %279, %278 : vector<8x32xf32>
    %281 = arith.divf %279, %280 : vector<8x32xf32>
    %282 = arith.mulf %267, %243 : vector<8x32xf32>
    %283 = arith.mulf %258, %272 : vector<8x32xf32>
    %284 = arith.addf %282, %283 : vector<8x32xf32>
    %285 = math.tanh %284 : vector<8x32xf32>
    %286 = arith.mulf %281, %285 : vector<8x32xf32>
    %287 = arith.index_cast %249 : i32 to index
    %c0_123 = arith.constant 0 : index
    %288 = vector.load %arg15[%287, %c0_123] : memref<64x32xf32, #tpu.memory_space<vmem>>, vector<8x32xf32>
    tpu.vector_store %arg15[%287, %c0_123], %286 {strides = array<i32>} : memref<64x32xf32, #tpu.memory_space<vmem>>, vector<8x32xf32>,
    %c6_i32 = arith.constant 6 : i32
    %c8_i32_124 = arith.constant 8 : i32
    %289 = arith.muli %c6_i32, %c8_i32_124 : i32
    %290 = tpu.assume_multiple %289, 8 : i32
    %291 = arith.index_cast %290 : i32 to index
    %c0_125 = arith.constant 0 : index
    %292 = vector.load %arg11[%291, %c0_125] : memref<64x32xf32, #tpu.memory_space<vmem>>, vector<8x32xf32>
    %cst_126 = arith.constant dense<0.000000e+00> : vector<8x32xf32>
    %293 = tpu.matmul %286, %34, %cst_126 {dimension_numbers = #tpu.dot_dimension_numbers<[1], [0], [0], [1], [0, 0, 1, 1], [], []>} : vector<8x32xf32>, vector<32x32xf32>, vector<8x32xf32> -> vector<8x32xf32>
    %294 = arith.addf %292, %293 : vector<8x32xf32>
    %295 = arith.negf %294 : vector<8x32xf32>
    %296 = math.exp %295 : vector<8x32xf32>
    %cst_127 = arith.constant 1.000000e+00 : f32
    %297 = vector.broadcast %cst_127 : f32 to vector<8x32xf32>
    %298 = arith.addf %297, %296 : vector<8x32xf32>
    %299 = arith.divf %297, %298 : vector<8x32xf32>
    %300 = arith.index_cast %290 : i32 to index
    %c0_128 = arith.constant 0 : index
    %301 = vector.load %arg12[%300, %c0_128] : memref<64x32xf32, #tpu.memory_space<vmem>>, vector<8x32xf32>
    %cst_129 = arith.constant dense<0.000000e+00> : vector<8x32xf32>
    %302 = tpu.matmul %286, %36, %cst_129 {dimension_numbers = #tpu.dot_dimension_numbers<[1], [0], [0], [1], [0, 0, 1, 1], [], []>} : vector<8x32xf32>, vector<32x32xf32>, vector<8x32xf32> -> vector<8x32xf32>
    %303 = arith.addf %301, %302 : vector<8x32xf32>
    %304 = arith.negf %303 : vector<8x32xf32>
    %305 = math.exp %304 : vector<8x32xf32>
    %cst_130 = arith.constant 1.000000e+00 : f32
    %306 = vector.broadcast %cst_130 : f32 to vector<8x32xf32>
    %307 = arith.addf %306, %305 : vector<8x32xf32>
    %308 = arith.divf %306, %307 : vector<8x32xf32>
    %309 = arith.index_cast %290 : i32 to index
    %c0_131 = arith.constant 0 : index
    %310 = vector.load %arg13[%309, %c0_131] : memref<64x32xf32, #tpu.memory_space<vmem>>, vector<8x32xf32>
    %cst_132 = arith.constant dense<0.000000e+00> : vector<8x32xf32>
    %311 = tpu.matmul %286, %38, %cst_132 {dimension_numbers = #tpu.dot_dimension_numbers<[1], [0], [0], [1], [0, 0, 1, 1], [], []>} : vector<8x32xf32>, vector<32x32xf32>, vector<8x32xf32> -> vector<8x32xf32>
    %312 = arith.addf %310, %311 : vector<8x32xf32>
    %313 = math.tanh %312 : vector<8x32xf32>
    %314 = arith.index_cast %290 : i32 to index
    %c0_133 = arith.constant 0 : index
    %315 = vector.load %arg14[%314, %c0_133] : memref<64x32xf32, #tpu.memory_space<vmem>>, vector<8x32xf32>
    %cst_134 = arith.constant dense<0.000000e+00> : vector<8x32xf32>
    %316 = tpu.matmul %286, %40, %cst_134 {dimension_numbers = #tpu.dot_dimension_numbers<[1], [0], [0], [1], [0, 0, 1, 1], [], []>} : vector<8x32xf32>, vector<32x32xf32>, vector<8x32xf32> -> vector<8x32xf32>
    %317 = arith.addf %315, %316 : vector<8x32xf32>
    %318 = arith.negf %317 : vector<8x32xf32>
    %319 = math.exp %318 : vector<8x32xf32>
    %cst_135 = arith.constant 1.000000e+00 : f32
    %320 = vector.broadcast %cst_135 : f32 to vector<8x32xf32>
    %321 = arith.addf %320, %319 : vector<8x32xf32>
    %322 = arith.divf %320, %321 : vector<8x32xf32>
    %323 = arith.mulf %308, %284 : vector<8x32xf32>
    %324 = arith.mulf %299, %313 : vector<8x32xf32>
    %325 = arith.addf %323, %324 : vector<8x32xf32>
    %326 = math.tanh %325 : vector<8x32xf32>
    %327 = arith.mulf %322, %326 : vector<8x32xf32>
    %328 = arith.index_cast %290 : i32 to index
    %c0_136 = arith.constant 0 : index
    %329 = vector.load %arg15[%328, %c0_136] : memref<64x32xf32, #tpu.memory_space<vmem>>, vector<8x32xf32>
    tpu.vector_store %arg15[%328, %c0_136], %327 {strides = array<i32>} : memref<64x32xf32, #tpu.memory_space<vmem>>, vector<8x32xf32>,
    %c7_i32 = arith.constant 7 : i32
    %c8_i32_137 = arith.constant 8 : i32
    %330 = arith.muli %c7_i32, %c8_i32_137 : i32
    %331 = tpu.assume_multiple %330, 8 : i32
    %332 = arith.index_cast %331 : i32 to index
    %c0_138 = arith.constant 0 : index
    %333 = vector.load %arg11[%332, %c0_138] : memref<64x32xf32, #tpu.memory_space<vmem>>, vector<8x32xf32>
    %cst_139 = arith.constant dense<0.000000e+00> : vector<8x32xf32>
    %334 = tpu.matmul %327, %34, %cst_139 {dimension_numbers = #tpu.dot_dimension_numbers<[1], [0], [0], [1], [0, 0, 1, 1], [], []>} : vector<8x32xf32>, vector<32x32xf32>, vector<8x32xf32> -> vector<8x32xf32>
    %335 = arith.addf %333, %334 : vector<8x32xf32>
    %336 = arith.negf %335 : vector<8x32xf32>
    %337 = math.exp %336 : vector<8x32xf32>
    %cst_140 = arith.constant 1.000000e+00 : f32
    %338 = vector.broadcast %cst_140 : f32 to vector<8x32xf32>
    %339 = arith.addf %338, %337 : vector<8x32xf32>
    %340 = arith.divf %338, %339 : vector<8x32xf32>
    %341 = arith.index_cast %331 : i32 to index
    %c0_141 = arith.constant 0 : index
    %342 = vector.load %arg12[%341, %c0_141] : memref<64x32xf32, #tpu.memory_space<vmem>>, vector<8x32xf32>
    %cst_142 = arith.constant dense<0.000000e+00> : vector<8x32xf32>
    %343 = tpu.matmul %327, %36, %cst_142 {dimension_numbers = #tpu.dot_dimension_numbers<[1], [0], [0], [1], [0, 0, 1, 1], [], []>} : vector<8x32xf32>, vector<32x32xf32>, vector<8x32xf32> -> vector<8x32xf32>
    %344 = arith.addf %342, %343 : vector<8x32xf32>
    %345 = arith.negf %344 : vector<8x32xf32>
    %346 = math.exp %345 : vector<8x32xf32>
    %cst_143 = arith.constant 1.000000e+00 : f32
    %347 = vector.broadcast %cst_143 : f32 to vector<8x32xf32>
    %348 = arith.addf %347, %346 : vector<8x32xf32>
    %349 = arith.divf %347, %348 : vector<8x32xf32>
    %350 = arith.index_cast %331 : i32 to index
    %c0_144 = arith.constant 0 : index
    %351 = vector.load %arg13[%350, %c0_144] : memref<64x32xf32, #tpu.memory_space<vmem>>, vector<8x32xf32>
    %cst_145 = arith.constant dense<0.000000e+00> : vector<8x32xf32>
    %352 = tpu.matmul %327, %38, %cst_145 {dimension_numbers = #tpu.dot_dimension_numbers<[1], [0], [0], [1], [0, 0, 1, 1], [], []>} : vector<8x32xf32>, vector<32x32xf32>, vector<8x32xf32> -> vector<8x32xf32>
    %353 = arith.addf %351, %352 : vector<8x32xf32>
    %354 = math.tanh %353 : vector<8x32xf32>
    %355 = arith.index_cast %331 : i32 to index
    %c0_146 = arith.constant 0 : index
    %356 = vector.load %arg14[%355, %c0_146] : memref<64x32xf32, #tpu.memory_space<vmem>>, vector<8x32xf32>
    %cst_147 = arith.constant dense<0.000000e+00> : vector<8x32xf32>
    %357 = tpu.matmul %327, %40, %cst_147 {dimension_numbers = #tpu.dot_dimension_numbers<[1], [0], [0], [1], [0, 0, 1, 1], [], []>} : vector<8x32xf32>, vector<32x32xf32>, vector<8x32xf32> -> vector<8x32xf32>
    %358 = arith.addf %356, %357 : vector<8x32xf32>
    %359 = arith.negf %358 : vector<8x32xf32>
    %360 = math.exp %359 : vector<8x32xf32>
    %cst_148 = arith.constant 1.000000e+00 : f32
    %361 = vector.broadcast %cst_148 : f32 to vector<8x32xf32>
    %362 = arith.addf %361, %360 : vector<8x32xf32>
    %363 = arith.divf %361, %362 : vector<8x32xf32>
    %364 = arith.mulf %349, %325 : vector<8x32xf32>
    %365 = arith.mulf %340, %354 : vector<8x32xf32>
    %366 = arith.addf %364, %365 : vector<8x32xf32>
    %367 = math.tanh %366 : vector<8x32xf32>
    %368 = arith.mulf %363, %367 : vector<8x32xf32>
    %369 = arith.index_cast %331 : i32 to index
    %c0_149 = arith.constant 0 : index
    %370 = vector.load %arg15[%369, %c0_149] : memref<64x32xf32, #tpu.memory_space<vmem>>, vector<8x32xf32>
    tpu.vector_store %arg15[%369, %c0_149], %368 {strides = array<i32>} : memref<64x32xf32, #tpu.memory_space<vmem>>, vector<8x32xf32>,
    %c8_i32_150 = arith.constant 8 : i32
    %c0_151 = arith.constant 0 : index
    %c0_152 = arith.constant 0 : index
    %371 = vector.load %arg15[%c0_151, %c0_152] : memref<64x32xf32, #tpu.memory_space<vmem>>, vector<64x32xf32>
    %c0_153 = arith.constant 0 : index
    %c0_154 = arith.constant 0 : index
    %372 = vector.load %arg4[%c0_153, %c0_154] : memref<32x128xf32, #tpu.memory_space<vmem>>, vector<32x128xf32>
    %cst_155 = arith.constant dense<0.000000e+00> : vector<64x128xf32>
    %373 = tpu.matmul %371, %372, %cst_155 {dimension_numbers = #tpu.dot_dimension_numbers<[1], [0], [0], [1], [0, 0, 1, 1], [], []>} : vector<64x32xf32>, vector<32x128xf32>, vector<64x128xf32> -> vector<64x128xf32>
    %c0_156 = arith.constant 0 : index
    %c0_157 = arith.constant 0 : index
    %374 = vector.load %arg5[%c0_156, %c0_157] : memref<1x128xf32, #tpu.memory_space<vmem>>, vector<1x128xf32>
    %375 = vector.broadcast %374 : vector<1x128xf32> to vector<64x128xf32>
    %376 = arith.addf %373, %375 : vector<64x128xf32>
    %cst_158 = arith.constant 0.000000e+00 : f32
    %377 = vector.broadcast %cst_158 : f32 to vector<64x128xf32>
    %378 = arith.maximumf %376, %377 : vector<64x128xf32>
    %c0_159 = arith.constant 0 : index
    %c0_160 = arith.constant 0 : index
    %379 = vector.load %arg6[%c0_159, %c0_160] : memref<128x64xf32, #tpu.memory_space<vmem>>, vector<128x64xf32>
    %cst_161 = arith.constant dense<0.000000e+00> : vector<64x64xf32>
    %380 = tpu.matmul %378, %379, %cst_161 {dimension_numbers = #tpu.dot_dimension_numbers<[1], [0], [0], [1], [0, 0, 1, 1], [], []>} : vector<64x128xf32>, vector<128x64xf32>, vector<64x64xf32> -> vector<64x64xf32>
    %c0_162 = arith.constant 0 : index
    %c0_163 = arith.constant 0 : index
    %381 = vector.load %arg7[%c0_162, %c0_163] : memref<1x64xf32, #tpu.memory_space<vmem>>, vector<1x64xf32>
    %382 = vector.broadcast %381 : vector<1x64xf32> to vector<64x64xf32>
    %383 = arith.addf %380, %382 : vector<64x64xf32>
    %cst_164 = arith.constant 0.000000e+00 : f32
    %384 = vector.broadcast %cst_164 : f32 to vector<64x64xf32>
    %385 = arith.maximumf %383, %384 : vector<64x64xf32>
    %c0_165 = arith.constant 0 : index
    %c0_166 = arith.constant 0 : index
    %386 = vector.load %arg8[%c0_165, %c0_166] : memref<1x64xf32, #tpu.memory_space<vmem>>, vector<1x64xf32>
    %cst_167 = arith.constant dense<0.000000e+00> : vector<1x64xf32>
    %387 = tpu.matmul %386, %385, %cst_167 {dimension_numbers = #tpu.dot_dimension_numbers<[1], [1], [0], [0], [0, 0, 1, 0], [], []>} : vector<1x64xf32>, vector<64x64xf32>, vector<1x64xf32> -> vector<1x64xf32>
    %c0_168 = arith.constant 0 : index
    %c0_169 = arith.constant 0 : index
    %388 = vector.load %arg9[%c0_168, %c0_169] : memref<1x1xf32, #tpu.memory_space<vmem>>, vector<1x1xf32>
    %389 = vector.broadcast %388 : vector<1x1xf32> to vector<1x64xf32>
    %390 = arith.addf %387, %389 : vector<1x64xf32>
    %c0_170 = arith.constant 0 : index
    %c0_171 = arith.constant 0 : index
    %391 = vector.load %arg10[%c0_170, %c0_171] : memref<1x64xf32, #tpu.memory_space<vmem>>, vector<1x64xf32>
    tpu.vector_store %arg10[%c0_170, %c0_171], %390 {strides = array<i32>} : memref<1x64xf32, #tpu.memory_space<vmem>>, vector<1x64xf32>,
    return
  }
}

</mosaic_0001>

<bundles_post_ra>
// kernel: tpu_custom_call.1
= control target key start
LH: loop header
LB: loop body
LE: loop exit
PB: predicated region body
PF: predicated region fallthrough
CT: control target
= control target key end

     0   :  { %s5435_s0 = inlined_call_operand.vmem [shape: f32[64,4], index: 0, kind: input, shape index: {}]   ;;  %s5436_s1 = inlined_call_operand.vmem [shape: f32[4,4,32], index: 1, kind: input, shape index: {}]   ;;  %s5437_s2 = inlined_call_operand.vmem [shape: f32[4,1,32], index: 2, kind: input, shape index: {}]   ;;  %s5438_s3 = inlined_call_operand.vmem [shape: f32[4,32,32], index: 3, kind: input, shape index: {}]   ;;  %s5439_s4 = inlined_call_operand.vmem [shape: f32[32,128], index: 4, kind: input, shape index: {}]   ;;  %s5440_s5 = inlined_call_operand.vmem [shape: f32[1,128], index: 5, kind: input, shape index: {}]   ;;  %s5441_s6 = inlined_call_operand.vmem [shape: f32[128,64], index: 6, kind: input, shape index: {}]   ;;  %s5442_s7 = inlined_call_operand.vmem [shape: f32[1,64], index: 7, kind: input, shape index: {}]   ;;  %s5443_s8 = inlined_call_operand.vmem [shape: f32[1,64], index: 8, kind: input, shape index: {}]   ;;  %s5444_s9 = inlined_call_operand.<no memory space> [shape: f32[1,1], index: 9, kind: input, shape index: {}]   ;;  %s5445_s10 = inlined_call_operand.hbm [shape: f32[1,64], index: 10, kind: output, shape index: {}]  }
   0x1   :  { %v15_v0 = vstv %s5444_s9 }
   0x2   :  { %16 = vst [vmem:[#allocation7] sm:$0x1] %v15_v0 }
   0x3   :  { %v46_v1 = vld [vmem:[%s5436_s1] sm:$0xf]  ;;  %vm79_vm0 = vcmask 1043456   ;;  %v3584_v2 = vld [vmem:[%s5436_s1 + $0x4] sm:$0xf]  ;;  %vm54_vm1 = vcmask 31744  }
   0x4   :  { %v38_v3 = vld [vmem:[%s5435_s0] sm:$0xff]  ;;  %3944 = vmatprep.subr.msk.mxu0 %vm79_vm0, %v46_v1  ;;  %3958 = vmatprep.subr.msk.mxu1 %vm79_vm0, %v3584_v2  ;;  %v39_v4 = vld [vmem:[%s5435_s0 + $0x8] sm:$0xff]  ;;  %v40_v7 = vld [vmem:[%s5435_s0 + $0x10] sm:$0xff] }
   0x5   :  { %3945 = vmatpush3.msk.msra.mxu0 %vm79_vm0, %v46_v1  ;;  %3946 = vmatprep.mubr.msk.f32.mxu0 %vm54_vm1, %v38_v3  ;;  %v3596_v5 = vld [vmem:[%s5436_s1 + $0x8] sm:$0xf]  ;;  %v3608_v6 = vld [vmem:[%s5436_s1 + $0xc] sm:$0xf]  ;;  %v41_v8 = vld [vmem:[%s5435_s0 + $0x18] sm:$0xff] }
   0x6   :  { %3959 = vmatpush3.msk.msra.mxu1 %vm79_vm0, %v3584_v2  ;;  %3960 = vmatprep.mubr.msk.f32.mxu1 %vm54_vm1, %v38_v3  ;;  %v42_v9 = vld [vmem:[%s5435_s0 + $0x20] sm:$0xff]  ;;  %v43_v10 = vld [vmem:[%s5435_s0 + $0x28] sm:$0xff] }
   0x7   :  { %3947 = vmatmul.mubr.msk.f32.vlgmr.msra.gmra.mxu0 %vm54_vm1, %v39_v4  ;;  %3961 = vmatmul.mubr.msk.f32.vlgmr.msra.gmra.mxu1 %vm54_vm1, %v39_v4 }
   0x8   :  { %3972 = vmatprep.subr.msk.mxu0 %vm79_vm0, %v3596_v5  ;;  %3986 = vmatprep.subr.msk.mxu1 %vm79_vm0, %v3608_v6 }
   0x9   :  { %3973 = vmatpush3.msk.msra.mxu0 %vm79_vm0, %v3596_v5  ;;  %3987 = vmatpush3.msk.msra.mxu1 %vm79_vm0, %v3608_v6 }
   0xa   :  { %3949 = vmatprep.mubr.msk.f32.mxu0 %vm54_vm1, %v40_v7  ;;  %3963 = vmatprep.mubr.msk.f32.mxu1 %vm54_vm1, %v40_v7 }
   0xb   :  { %3950 = vmatmul.mubr.msk.f32.gmra.mxu0 %vm54_vm1, %v41_v8  ;;  %3964 = vmatmul.mubr.msk.f32.gmra.mxu1 %vm54_vm1, %v41_v8 }
   0xc   :  { %3952 = vmatprep.mubr.msk.f32.mxu0 %vm54_vm1, %v42_v9  ;;  %3966 = vmatprep.mubr.msk.f32.mxu1 %vm54_vm1, %v42_v9 }
   0xd   :  { %17 = vsyncpa [#allocation9], 0  ;;  %v44_v11 = vld [vmem:[%s5435_s0 + $0x30] sm:$0xff]  ;;  %v4606_v12 = vmov 0.0   ;;  %v45_v13 = vld [vmem:[%s5435_s0 + $0x38] sm:$0xff]  ;;  %vm4607_vm2 = vmmov 0  }
   0xe   :  { %4000 = vmatprep.subr.mxu0 %v4606_v12  ;;  %4011 = vmatprep.subr.mxu1 %v4606_v12  ;;  %v4735_v14 = vld [vmem:[%s5438_s3 + $0x18] sm:$0xff]  ;;  %v4751_v16 = vld [vmem:[%s5438_s3 + $0x10] sm:$0xff]  ;;  %v4769_v18 = vld [vmem:[%s5438_s3 + $0x8] sm:$0xff]  ;;  %vm188_vm3 = vcmask 261120   ;;  %vm3460_vm4 = vcmask 523264   ;;  %vm3558_vm5 = vcmask 516096  }
   0xf   :  { %3953 = vmatmul.mubr.msk.f32.gmra.mxu0 %vm54_vm1, %v43_v10  ;;  %3967 = vmatmul.mubr.msk.f32.gmra.mxu1 %vm54_vm1, %v43_v10  ;;  %v4740_v15 = vld [vmem:[%s5438_s3 + $0x38] sm:$0xff]  ;;  %v4756_v17 = vld [vmem:[%s5438_s3 + $0x30] sm:$0xff]  ;;  %v4774_v19 = vld [vmem:[%s5438_s3 + $0x28] sm:$0xff] }
  0x10   :  { %3955 = vmatprep.mubr.msk.f32.mxu0 %vm54_vm1, %v44_v11  ;;  %3969 = vmatprep.mubr.msk.f32.mxu1 %vm54_vm1, %v44_v11  ;;  %v4787_v20 = vld [vmem:[%s5438_s3] sm:$0xff]  ;;  %v4807_v22 = vld [vmem:[%s5438_s3 + $0x58] sm:$0xff]  ;;  %v4821_v24 = vld [vmem:[%s5438_s3 + $0x50] sm:$0xff] }
  0x11   :  { %v4792_v21 = vld [vmem:[%s5438_s3 + $0x20] sm:$0xff]  ;;  %v4812_v23 = vld [vmem:[%s5438_s3 + $0x78] sm:$0xff]  ;;  %v4826_v25 = vld [vmem:[%s5438_s3 + $0x70] sm:$0xff] }
  0x12   :  { %v4835_v26 = vld [vmem:[%s5438_s3 + $0x48] sm:$0xff]  ;;  %v4849_v28 = vld [vmem:[%s5438_s3 + $0x40] sm:$0xff] }
  0x13   :  { %3956 = vmatmul.mubr.msk.f32.gmra.mxu0 %vm54_vm1, %v45_v13  ;;  %3970 = vmatmul.mubr.msk.f32.gmra.mxu1 %vm54_vm1, %v45_v13  ;;  %v4840_v27 = vld [vmem:[%s5438_s3 + $0x68] sm:$0xff]  ;;  %v4856_v29 = vld [vmem:[%s5438_s3 + $0x60] sm:$0xff] }
  0x14   :  { %3974 = vmatprep.mubr.msk.f32.mxu0 %vm54_vm1, %v38_v3  ;;  %3988 = vmatprep.mubr.msk.f32.mxu1 %vm54_vm1, %v38_v3  ;;  %v3574_v30 = vld [vmem:[%s5437_s2] ss:$0 sm:$0xff]  ;;  %v3586_v31 = vld [vmem:[%s5437_s2 + $0x1] ss:$0 sm:$0xff]  ;;  %v3598_v62 = vld [vmem:[%s5437_s2 + $0x2] ss:$0 sm:$0xff] }
  0x15   :  { %v3610_v63 = vld [vmem:[%s5437_s2 + $0x3] ss:$0 sm:$0xff]  ;;  %s4609_s2 = smov [#allocation8]  }
  0x17   :  { %3975 = vmatmul.mubr.msk.f32.vlgmr.msra.gmra.mxu0 %vm54_vm1, %v39_v4  ;;  %3989 = vmatmul.mubr.msk.f32.vlgmr.msra.gmra.mxu1 %vm54_vm1, %v39_v4 }
  0x18   :  { %4001 = vmatpush3.msra.mxu0 %v4735_v14  ;;  %4012 = vmatpush3.msra.mxu1 %v4740_v15 }
  0x19   :  { %3977 = vmatprep.mubr.msk.f32.mxu0 %vm54_vm1, %v40_v7  ;;  %3991 = vmatprep.mubr.msk.f32.mxu1 %vm54_vm1, %v40_v7 }
  0x1a   :  { %4002 = vmatprep.subr.mxu0 %v4606_v12  ;;  %4013 = vmatprep.subr.mxu1 %v4606_v12 }
  0x1b   :  { %3978 = vmatmul.mubr.msk.f32.gmra.mxu0 %vm54_vm1, %v41_v8  ;;  %3992 = vmatmul.mubr.msk.f32.gmra.mxu1 %vm54_vm1, %v41_v8 }
  0x1c   :  { %4003 = vmatpush3.msra.mxu0 %v4751_v16  ;;  %4014 = vmatpush3.msra.mxu1 %v4756_v17 }
  0x1d   :  { %3980 = vmatprep.mubr.msk.f32.mxu0 %vm54_vm1, %v42_v9  ;;  %3994 = vmatprep.mubr.msk.f32.mxu1 %vm54_vm1, %v42_v9 }
  0x1e   :  { %4004 = vmatprep.subr.mxu0 %v4606_v12  ;;  %4015 = vmatprep.subr.mxu1 %v4606_v12 }
  0x1f   :  { %3981 = vmatmul.mubr.msk.f32.gmra.mxu0 %vm54_vm1, %v43_v10  ;;  %3995 = vmatmul.mubr.msk.f32.gmra.mxu1 %vm54_vm1, %v43_v10 }
  0x20   :  { %4005 = vmatpush3.msra.mxu0 %v4769_v18  ;;  %4016 = vmatpush3.msra.mxu1 %v4774_v19 }
  0x21   :  { %3983 = vmatprep.mubr.msk.f32.mxu0 %vm54_vm1, %v44_v11  ;;  %3997 = vmatprep.mubr.msk.f32.mxu1 %vm54_vm1, %v44_v11 }
  0x22   :  { %4006 = vmatprep.subr.mxu0 %v4606_v12  ;;  %4017 = vmatprep.subr.mxu1 %v4606_v12 }
  0x23   :  { %3984 = vmatmul.mubr.msk.f32.gmra.mxu0 %vm54_vm1, %v45_v13  ;;  %3998 = vmatmul.mubr.msk.f32.gmra.mxu1 %vm54_vm1, %v45_v13 }
  0x24   :  { %4007 = vmatpush3.msra.mxu0 %v4787_v20  ;;  %4018 = vmatpush3.msra.mxu1 %v4792_v21 }
  0x25   :  { %4008 = vmatprep.mubr.msk.f32.mxu0 %vm4607_vm2, %v4606_v12  ;;  %4019 = vmatprep.mubr.msk.f32.mxu1 %vm4607_vm2, %v4606_v12 }
  0x26   :  { %4022 = vmatprep.subr.mxu0 %v4606_v12  ;;  %4033 = vmatprep.subr.mxu1 %v4606_v12 }
  0x27   :  { %4009 = vmatmul.mubr.f32.vlgmr.msra.gmra.mxu0 %v4606_v12  ;;  %4020 = vmatmul.mubr.f32.vlgmr.msra.gmra.mxu1 %v4606_v12 }
  0x28   :  { %4023 = vmatpush3.msra.mxu0 %v4807_v22  ;;  %4034 = vmatpush3.msra.mxu1 %v4812_v23 }
  0x29   :  { %4024 = vmatprep.subr.mxu0 %v4606_v12  ;;  %4035 = vmatprep.subr.mxu1 %v4606_v12 }
  0x2a   :  { %4025 = vmatpush3.msra.mxu0 %v4821_v24  ;;  %4036 = vmatpush3.msra.mxu1 %v4826_v25 }
  0x2b   :  { %4026 = vmatprep.subr.mxu0 %v4606_v12  ;;  %4037 = vmatprep.subr.mxu1 %v4606_v12 }
  0x2c   :  { %4027 = vmatpush3.msra.mxu0 %v4835_v26  ;;  %4038 = vmatpush3.msra.mxu1 %v4840_v27 }
  0x2d   :  { %4028 = vmatprep.subr.mxu0 %v4606_v12  ;;  %4039 = vmatprep.subr.mxu1 %v4606_v12 }
  0x2e   :  { %4029 = vmatpush3.msra.mxu0 %v4849_v28  ;;  %4030 = vmatprep.mubr.msk.f32.mxu0 %vm4607_vm2, %v4606_v12 }
  0x2f   :  { %4040 = vmatpush3.msra.mxu1 %v4856_v29  ;;  %4041 = vmatprep.mubr.msk.f32.mxu1 %vm4607_vm2, %v4606_v12 }
  0x30   :  { %4031 = vmatmul.mubr.f32.vlgmr.msra.gmra.mxu0 %v4606_v12  ;;  %4042 = vmatmul.mubr.f32.vlgmr.msra.gmra.mxu1 %v4606_v12 }
  0x31   :  { %4044 = vmatprep.subr.mxu0 %v4606_v12  ;;  %4055 = vmatprep.subr.mxu1 %v4606_v12 }
  0x32   :  { %4045 = vmatpush3.msra.mxu0 %v4735_v14  ;;  %4056 = vmatpush3.msra.mxu1 %v4740_v15 }
  0x33   :  { %4046 = vmatprep.subr.mxu0 %v4606_v12  ;;  %4057 = vmatprep.subr.mxu1 %v4606_v12 }
  0x34   :  { %4047 = vmatpush3.msra.mxu0 %v4751_v16  ;;  %4058 = vmatpush3.msra.mxu1 %v4756_v17 }
  0x35   :  { %4048 = vmatprep.subr.mxu0 %v4606_v12  ;;  %4059 = vmatprep.subr.mxu1 %v4606_v12 }
  0x36   :  { %4049 = vmatpush3.msra.mxu0 %v4769_v18  ;;  %4060 = vmatpush3.msra.mxu1 %v4774_v19 }
  0x37   :  { %4050 = vmatprep.subr.mxu0 %v4606_v12  ;;  %4061 = vmatprep.subr.mxu1 %v4606_v12 }
  0x38   :  { %4051 = vmatpush3.msra.mxu0 %v4787_v20  ;;  %4062 = vmatpush3.msra.mxu1 %v4792_v21 }
  0x39   :  { %4052 = vmatprep.mubr.msk.f32.mxu0 %vm4607_vm2, %v4606_v12  ;;  %4063 = vmatprep.mubr.msk.f32.mxu1 %vm4607_vm2, %v4606_v12 }
  0x3a   :  { %4066 = vmatprep.subr.mxu0 %v4606_v12  ;;  %4077 = vmatprep.subr.mxu1 %v4606_v12 }
  0xc7   :  { %v3948_v32 = vpop.f32.mrf.mxu0  ;;  %v3962_v33 = vpop.f32.mrf.mxu1 }
  0xc8   :  { %v155_v34 = vadd.f32 %v3948_v32, %v3574_v30  ;;  %v282_v35 = vadd.f32 %v3962_v33, %v3586_v31 }
  0xc9   :  { %v149_v36 = vpop.f32.mrf.mxu0  ;;  %v276_v37 = vpop.f32.mrf.mxu1 }
  0xca   :  { %190 = vst.msk [vmem:[#allocation2 + $0x8] sm:$0xff] %vm188_vm3, %v155_v34  ;;  %316 = vst.msk [vmem:[#allocation3 + $0x8] sm:$0xff] %vm188_vm3, %v282_v35  ;;  %v150_v38 = vadd.f32 %v3574_v30, %v149_v36  ;;  %v277_v39 = vadd.f32 %v3586_v31, %v276_v37 }
  0xcb   :  { %v3951_v40 = vpop.f32.mrf.mxu0  ;;  %v3965_v41 = vpop.f32.mrf.mxu1 }
  0xcc   :  { %189 = vst.msk [vmem:[#allocation2] sm:$0xff] %vm188_vm3, %v150_v38  ;;  %315 = vst.msk [vmem:[#allocation3] sm:$0xff] %vm188_vm3, %v277_v39  ;;  %v165_v42 = vadd.f32 %v3951_v40, %v3574_v30  ;;  %v292_v43 = vadd.f32 %v3965_v41, %v3586_v31 }
  0xcd   :  { %v159_v44 = vpop.f32.mrf.mxu0  ;;  %v286_v45 = vpop.f32.mrf.mxu1 }
  0xce   :  { %192 = vst.msk [vmem:[#allocation2 + $0x18] sm:$0xff] %vm188_vm3, %v165_v42  ;;  %318 = vst.msk [vmem:[#allocation3 + $0x18] sm:$0xff] %vm188_vm3, %v292_v43  ;;  %v160_v46 = vadd.f32 %v3574_v30, %v159_v44  ;;  %v287_v47 = vadd.f32 %v3586_v31, %v286_v45 }
  0xcf   :  { %v3954_v48 = vpop.f32.mrf.mxu0  ;;  %v3968_v49 = vpop.f32.mrf.mxu1 }
  0xd0   :  { %191 = vst.msk [vmem:[#allocation2 + $0x10] sm:$0xff] %vm188_vm3, %v160_v46  ;;  %317 = vst.msk [vmem:[#allocation3 + $0x10] sm:$0xff] %vm188_vm3, %v287_v47  ;;  %v175_v50 = vadd.f32 %v3954_v48, %v3574_v30  ;;  %v302_v51 = vadd.f32 %v3968_v49, %v3586_v31 }
  0xd1   :  { %v169_v52 = vpop.f32.mrf.mxu0  ;;  %v296_v53 = vpop.f32.mrf.mxu1 }
  0xd2   :  { %194 = vst.msk [vmem:[#allocation2 + $0x28] sm:$0xff] %vm188_vm3, %v175_v50  ;;  %320 = vst.msk [vmem:[#allocation3 + $0x28] sm:$0xff] %vm188_vm3, %v302_v51  ;;  %v170_v54 = vadd.f32 %v3574_v30, %v169_v52  ;;  %v297_v55 = vadd.f32 %v3586_v31, %v296_v53 }
  0xd3   :  { %v3957_v56 = vpop.f32.mrf.mxu0  ;;  %v3971_v57 = vpop.f32.mrf.mxu1  ;;  %v594_v51 = vld [vmem:[#allocation2] sm:$0xff] }
  0xd4   :  { %193 = vst.msk [vmem:[#allocation2 + $0x20] sm:$0xff] %vm188_vm3, %v170_v54  ;;  %319 = vst.msk [vmem:[#allocation3 + $0x20] sm:$0xff] %vm188_vm3, %v297_v55  ;;  %v185_v58 = vadd.f32 %v3957_v56, %v3574_v30  ;;  %v312_v59 = vadd.f32 %v3971_v57, %v3586_v31  ;;  %v675_v53 = vld [vmem:[#allocation3] sm:$0xff] }
  0xd5   :  { %v179_v60 = vpop.f32.mrf.mxu0  ;;  %v306_v61 = vpop.f32.mrf.mxu1 }
  0xd6   :  { %196 = vst.msk [vmem:[#allocation2 + $0x38] sm:$0xff] %vm188_vm3, %v185_v58  ;;  %322 = vst.msk [vmem:[#allocation3 + $0x38] sm:$0xff] %vm188_vm3, %v312_v59  ;;  %v180_v0 = vadd.f32 %v3574_v30, %v179_v60  ;;  %v307_v1 = vadd.f32 %v3586_v31, %v306_v61 }
  0xd7   :  { %v3976_v2 = vpop.f32.mrf.mxu0  ;;  %v3990_v3 = vpop.f32.mrf.mxu1 }
  0xd8   :  { %195 = vst.msk [vmem:[#allocation2 + $0x30] sm:$0xff] %vm188_vm3, %v180_v0  ;;  %321 = vst.msk [vmem:[#allocation3 + $0x30] sm:$0xff] %vm188_vm3, %v307_v1  ;;  %v408_v4 = vadd.f32 %v3976_v2, %v3598_v62  ;;  %v534_v5 = vadd.f32 %v3990_v3, %v3610_v63 }
  0xd9   :  { %v402_v6 = vpop.f32.mrf.mxu0  ;;  %v528_v7 = vpop.f32.mrf.mxu1 }
  0xda   :  { %442 = vst.msk [vmem:[#allocation4 + $0x8] sm:$0xff] %vm188_vm3, %v408_v4  ;;  %568 = vst.msk [vmem:[#allocation5 + $0x8] sm:$0xff] %vm188_vm3, %v534_v5  ;;  %v403_v8 = vadd.f32 %v3598_v62, %v402_v6  ;;  %v529_v9 = vadd.f32 %v3610_v63, %v528_v7 }
  0xdb   :  { %v3979_v10 = vpop.f32.mrf.mxu0  ;;  %v3993_v11 = vpop.f32.mrf.mxu1 }
  0xdc   :  { %441 = vst.msk [vmem:[#allocation4] sm:$0xff] %vm188_vm3, %v403_v8  ;;  %567 = vst.msk [vmem:[#allocation5] sm:$0xff] %vm188_vm3, %v529_v9  ;;  %v418_v13 = vadd.f32 %v3979_v10, %v3598_v62  ;;  %v544_v30 = vadd.f32 %v3993_v11, %v3610_v63 }
  0xdd   :  { %v412_v31 = vpop.f32.mrf.mxu0  ;;  %v538_v32 = vpop.f32.mrf.mxu1 }
  0xde   :  { %444 = vst.msk [vmem:[#allocation4 + $0x18] sm:$0xff] %vm188_vm3, %v418_v13  ;;  %570 = vst.msk [vmem:[#allocation5 + $0x18] sm:$0xff] %vm188_vm3, %v544_v30  ;;  %v413_v33 = vadd.f32 %v3598_v62, %v412_v31  ;;  %v539_v34 = vadd.f32 %v3610_v63, %v538_v32 }
  0xdf   :  { %v3982_v35 = vpop.f32.mrf.mxu0  ;;  %v3996_v36 = vpop.f32.mrf.mxu1 }
  0xe0   :  { %443 = vst.msk [vmem:[#allocation4 + $0x10] sm:$0xff] %vm188_vm3, %v413_v33  ;;  %569 = vst.msk [vmem:[#allocation5 + $0x10] sm:$0xff] %vm188_vm3, %v539_v34  ;;  %v428_v37 = vadd.f32 %v3982_v35, %v3598_v62  ;;  %v554_v38 = vadd.f32 %v3996_v36, %v3610_v63 }
  0xe1   :  { %v422_v39 = vpop.f32.mrf.mxu0  ;;  %v548_v40 = vpop.f32.mrf.mxu1 }
  0xe2   :  { %446 = vst.msk [vmem:[#allocation4 + $0x28] sm:$0xff] %vm188_vm3, %v428_v37  ;;  %572 = vst.msk [vmem:[#allocation5 + $0x28] sm:$0xff] %vm188_vm3, %v554_v38  ;;  %v423_v41 = vadd.f32 %v3598_v62, %v422_v39  ;;  %v549_v42 = vadd.f32 %v3610_v63, %v548_v40  ;;  %v911_v38 = vld [vmem:[#allocation2 + $0x8] sm:$0xff] }
  0xe3   :  { %v3985_v43 = vpop.f32.mrf.mxu0  ;;  %v3999_v44 = vpop.f32.mrf.mxu1  ;;  %v753_v3 = vld [vmem:[#allocation4] sm:$0xff]  ;;  %v993_v40 = vld [vmem:[#allocation3 + $0x8] sm:$0xff] }
  0xe4   :  { %445 = vst.msk [vmem:[#allocation4 + $0x20] sm:$0xff] %vm188_vm3, %v423_v41  ;;  %571 = vst.msk [vmem:[#allocation5 + $0x20] sm:$0xff] %vm188_vm3, %v549_v42  ;;  %v438_v45 = vadd.f32 %v3985_v43, %v3598_v62  ;;  %v564_v46 = vadd.f32 %v3999_v44, %v3610_v63 }
  0xe5   :  { %v432_v47 = vpop.f32.mrf.mxu0  ;;  %v558_v48 = vpop.f32.mrf.mxu1 }
  0xe6   :  { %448 = vst.msk [vmem:[#allocation4 + $0x38] sm:$0xff] %vm188_vm3, %v438_v45  ;;  %574 = vst.msk [vmem:[#allocation5 + $0x38] sm:$0xff] %vm188_vm3, %v564_v46  ;;  %v433_v49 = vadd.f32 %v3598_v62, %v432_v47  ;;  %v559_v50 = vadd.f32 %v3610_v63, %v558_v48  ;;  %v826_v62 = vld [vmem:[#allocation5] sm:$0xff] }
  0xe7   :  { %v664_v52 = vpop.f32.mrf.mxu0  ;;  %v742_v54 = vpop.f32.mrf.mxu1 }
  0xe8   :  { %447 = vst.msk [vmem:[#allocation4 + $0x30] sm:$0xff] %vm188_vm3, %v433_v49  ;;  %573 = vst.msk [vmem:[#allocation5 + $0x30] sm:$0xff] %vm188_vm3, %v559_v50  ;;  %v668_v55 = vadd.f32 %v664_v52, %v594_v51  ;;  %v746_v56 = vadd.f32 %v742_v54, %v675_v53  ;;  %v1146_v50 = vld [vmem:[#allocation5 + $0x8] sm:$0xff] }
  0xe9   :  { %v4010_v57 = vpop.f32.mrf.mxu0  ;;  %v4021_v58 = vpop.f32.mrf.mxu1  ;;  %v1072_v54 = vld [vmem:[#allocation4 + $0x8] sm:$0xff] }
  0xea   :  { %v3632_v59 = vmul.f32 -1.442695, %v668_v55  ;;  %v3633_v60 = vmul.f32 -1.442695, %v746_v56 }
  0xec   :  { %4440 = vpow2.f32 %v3632_v59 }
  0xed   :  { %4442 = vpow2.f32 %v3633_v60 }
  0xf0   :  { %v820_v61 = vpop.f32.mrf.mxu0  ;;  %v893_v0 = vpop.f32.mrf.mxu1 }
  0xf1   :  { %v897_v63 = vadd.f32 %v893_v0, %v826_v62  ;;  %v824_v5 = vadd.f32 %v820_v61, %v753_v3 }
  0xf2   :  { %v4032_v1 = vpop.f32.mrf.mxu0  ;;  %v4043_v2 = vpop.f32.mrf.mxu1 }
  0xf3   :  { %v3634_v4 = vmul.f32 -1.442695, %v897_v63 }
  0xf5   :  { %4444 = vpow2.f32 %v3634_v4 }
  0xf6   :  { %4446 = vtanh.f32 %v824_v5 }
  0xf9   :  { %v4441_v6 = vpop.eup %4440 }
  0xfa   :  { %v4443_v7 = vpop.eup %4442  ;;  %v672_v8 = vadd.f32 1.0, %v4441_v6 }
  0xfb   :  { %v750_v9 = vadd.f32 1.0, %v4443_v7 }
  0xfc   :  { %4448 = vrcp.f32 %v672_v8  ;;  %v1232_v8 = vld [vmem:[#allocation2 + $0x10] sm:$0xff] }
  0xfd   :  { %4450 = vrcp.f32 %v750_v9 }
 0x102   :  { %v4445_v10 = vpop.eup %4444 }
 0x103   :  { %v4447_v11 = vpop.eup %4446  ;;  %v901_v32 = vadd.f32 1.0, %v4445_v10  ;;  %v1314_v10 = vld [vmem:[#allocation3 + $0x10] sm:$0xff] }
 0x105   :  { %4452 = vrcp.f32 %v901_v32 }
 0x109   :  { %v4449_v13 = vpop.eup %4448 }
 0x10a   :  { %v4451_v30 = vpop.eup %4450  ;;  %v905_v31 = vmul.f32 %v4449_v13, %v4447_v11 }
 0x10b   :  { %v904_v33 = vmul.f32 0.0, %v4451_v30 }
 0x10d   :  { %v4934_v34 = vadd.f32 %v905_v31, %v904_v33 }
 0x10f   :  { %4454 = vtanh.f32 %v4934_v34 }
 0x112   :  { %v4453_v35 = vpop.eup %4452 }
 0x11c   :  { %v4455_v36 = vpop.eup %4454 }
 0x11d   :  { %v908_v37 = vmul.f32 %v4455_v36, %v4453_v35 }
 0x11f   :  { %909 = vst.msk [vmem:[#allocation6] sm:$0xff] %vm188_vm3, %v908_v37  ;;  %4053 = vmatmul.mubr.msk.f32.vlgmr.msra.gmra.mxu0 %vm188_vm3, %v908_v37  ;;  %4064 = vmatmul.mubr.msk.f32.vlgmr.msra.gmra.mxu1 %vm188_vm3, %v908_v37 }
 0x120   :  { %4067 = vmatpush3.msra.mxu0 %v4807_v22  ;;  %4078 = vmatpush3.msra.mxu1 %v4812_v23 }
 0x121   :  { %4068 = vmatprep.subr.mxu0 %v4606_v12  ;;  %4079 = vmatprep.subr.mxu1 %v4606_v12 }
 0x122   :  { %4069 = vmatpush3.msra.mxu0 %v4821_v24  ;;  %4080 = vmatpush3.msra.mxu1 %v4826_v25 }
 0x123   :  { %4070 = vmatprep.subr.mxu0 %v4606_v12  ;;  %4081 = vmatprep.subr.mxu1 %v4606_v12 }
 0x124   :  { %4071 = vmatpush3.msra.mxu0 %v4835_v26  ;;  %4082 = vmatpush3.msra.mxu1 %v4840_v27 }
 0x125   :  { %4072 = vmatprep.subr.mxu0 %v4606_v12  ;;  %4083 = vmatprep.subr.mxu1 %v4606_v12 }
 0x126   :  { %4073 = vmatpush3.msra.mxu0 %v4849_v28  ;;  %4074 = vmatprep.mubr.msk.f32.mxu0 %vm4607_vm2, %v4606_v12 }
 0x127   :  { %4084 = vmatpush3.msra.mxu1 %v4856_v29  ;;  %4085 = vmatprep.mubr.msk.f32.mxu1 %vm4607_vm2, %v4606_v12 }
 0x128   :  { %4075 = vmatmul.mubr.msk.f32.vlgmr.msra.gmra.mxu0 %vm188_vm3, %v908_v37  ;;  %4086 = vmatmul.mubr.msk.f32.vlgmr.msra.gmra.mxu1 %vm188_vm3, %v908_v37  ;;  %v1467_v37 = vld [vmem:[#allocation5 + $0x10] sm:$0xff] }
 0x129   :  { %4088 = vmatprep.subr.mxu0 %v4606_v12  ;;  %4099 = vmatprep.subr.mxu1 %v4606_v12 }
 0x12a   :  { %4089 = vmatpush3.msra.mxu0 %v4735_v14  ;;  %4100 = vmatpush3.msra.mxu1 %v4740_v15 }
 0x12b   :  { %4090 = vmatprep.subr.mxu0 %v4606_v12  ;;  %4101 = vmatprep.subr.mxu1 %v4606_v12 }
 0x12c   :  { %4091 = vmatpush3.msra.mxu0 %v4751_v16  ;;  %4102 = vmatpush3.msra.mxu1 %v4756_v17 }
 0x12d   :  { %4092 = vmatprep.subr.mxu0 %v4606_v12  ;;  %4103 = vmatprep.subr.mxu1 %v4606_v12 }
 0x12e   :  { %4093 = vmatpush3.msra.mxu0 %v4769_v18  ;;  %4104 = vmatpush3.msra.mxu1 %v4774_v19 }
 0x12f   :  { %4094 = vmatprep.subr.mxu0 %v4606_v12  ;;  %4105 = vmatprep.subr.mxu1 %v4606_v12 }
 0x130   :  { %4095 = vmatpush3.msra.mxu0 %v4787_v20  ;;  %4106 = vmatpush3.msra.mxu1 %v4792_v21 }
 0x131   :  { %4096 = vmatprep.mubr.msk.f32.mxu0 %vm4607_vm2, %v4606_v12  ;;  %4107 = vmatprep.mubr.msk.f32.mxu1 %vm4607_vm2, %v4606_v12 }
 0x132   :  { %4110 = vmatprep.subr.mxu0 %v4606_v12  ;;  %4121 = vmatprep.subr.mxu1 %v4606_v12 }
 0x1df   :  { %v981_v39 = vpop.f32.mrf.mxu0  ;;  %v1060_v41 = vpop.f32.mrf.mxu1 }
 0x1e0   :  { %v985_v42 = vadd.f32 %v981_v39, %v911_v38  ;;  %v1064_v43 = vadd.f32 %v1060_v41, %v993_v40  ;;  %v1393_v41 = vld [vmem:[#allocation4 + $0x10] sm:$0xff] }
 0x1e1   :  { %v4054_v44 = vpop.f32.mrf.mxu0  ;;  %v4065_v45 = vpop.f32.mrf.mxu1 }
 0x1e2   :  { %v3636_v46 = vmul.f32 -1.442695, %v985_v42  ;;  %v3638_v47 = vmul.f32 -1.442695, %v1064_v43 }
 0x1e4   :  { %4456 = vpow2.f32 %v3636_v46 }
 0x1e5   :  { %4458 = vpow2.f32 %v3638_v47 }
 0x1e8   :  { %v1139_v48 = vpop.f32.mrf.mxu0  ;;  %v1213_v49 = vpop.f32.mrf.mxu1 }
 0x1e9   :  { %v1217_v51 = vadd.f32 %v1213_v49, %v1146_v50  ;;  %v1143_v56 = vadd.f32 %v1139_v48, %v1072_v54 }
 0x1ea   :  { %v4076_v52 = vpop.f32.mrf.mxu0  ;;  %v4087_v53 = vpop.f32.mrf.mxu1 }
 0x1eb   :  { %v3641_v55 = vmul.f32 -1.442695, %v1217_v51 }
 0x1ed   :  { %4460 = vpow2.f32 %v3641_v55 }
 0x1ee   :  { %4462 = vtanh.f32 %v1143_v56 }
 0x1f1   :  { %v4457_v57 = vpop.eup %4456 }
 0x1f2   :  { %v4459_v58 = vpop.eup %4458  ;;  %v989_v59 = vadd.f32 1.0, %v4457_v57 }
 0x1f3   :  { %v1068_v60 = vadd.f32 1.0, %v4459_v58 }
 0x1f4   :  { %4464 = vrcp.f32 %v989_v59  ;;  %v1553_v59 = vld [vmem:[#allocation2 + $0x18] sm:$0xff] }
 0x1f5   :  { %4466 = vrcp.f32 %v1068_v60 }
 0x1fa   :  { %v4461_v61 = vpop.eup %4460 }
 0x1fb   :  { %v4463_v0 = vpop.eup %4462  ;;  %v1221_v2 = vadd.f32 1.0, %v4461_v61  ;;  %v1635_v61 = vld [vmem:[#allocation3 + $0x18] sm:$0xff] }
 0x1fd   :  { %4468 = vrcp.f32 %v1221_v2 }
 0x201   :  { %v4465_v62 = vpop.eup %4464 }
 0x202   :  { %v4467_v63 = vpop.eup %4466  ;;  %v1225_v1 = vmul.f32 %v4465_v62, %v4463_v0 }
 0x203   :  { %v1224_v3 = vmul.f32 %v4467_v63, %v4934_v34 }
 0x205   :  { %v4983_v4 = vadd.f32 %v1225_v1, %v1224_v3 }
 0x207   :  { %4470 = vtanh.f32 %v4983_v4 }
 0x20a   :  { %v4469_v5 = vpop.eup %4468 }
 0x214   :  { %v4471_v6 = vpop.eup %4470 }
 0x215   :  { %v1228_v7 = vmul.f32 %v4471_v6, %v4469_v5 }
 0x217   :  { %1230 = vst.msk [vmem:[#allocation6 + $0x8] sm:$0xff] %vm188_vm3, %v1228_v7  ;;  %4097 = vmatmul.mubr.msk.f32.vlgmr.msra.gmra.mxu0 %vm188_vm3, %v1228_v7  ;;  %4108 = vmatmul.mubr.msk.f32.vlgmr.msra.gmra.mxu1 %vm188_vm3, %v1228_v7 }
 0x218   :  { %4111 = vmatpush3.msra.mxu0 %v4807_v22  ;;  %4122 = vmatpush3.msra.mxu1 %v4812_v23 }
 0x219   :  { %4112 = vmatprep.subr.mxu0 %v4606_v12  ;;  %4123 = vmatprep.subr.mxu1 %v4606_v12 }
 0x21a   :  { %4113 = vmatpush3.msra.mxu0 %v4821_v24  ;;  %4124 = vmatpush3.msra.mxu1 %v4826_v25 }
 0x21b   :  { %4114 = vmatprep.subr.mxu0 %v4606_v12  ;;  %4125 = vmatprep.subr.mxu1 %v4606_v12 }
 0x21c   :  { %4115 = vmatpush3.msra.mxu0 %v4835_v26  ;;  %4126 = vmatpush3.msra.mxu1 %v4840_v27 }
 0x21d   :  { %4116 = vmatprep.subr.mxu0 %v4606_v12  ;;  %4127 = vmatprep.subr.mxu1 %v4606_v12 }
 0x21e   :  { %4117 = vmatpush3.msra.mxu0 %v4849_v28  ;;  %4118 = vmatprep.mubr.msk.f32.mxu0 %vm4607_vm2, %v4606_v12 }
 0x21f   :  { %4128 = vmatpush3.msra.mxu1 %v4856_v29  ;;  %4129 = vmatprep.mubr.msk.f32.mxu1 %vm4607_vm2, %v4606_v12 }
 0x220   :  { %4119 = vmatmul.mubr.msk.f32.vlgmr.msra.gmra.mxu0 %vm188_vm3, %v1228_v7  ;;  %4130 = vmatmul.mubr.msk.f32.vlgmr.msra.gmra.mxu1 %vm188_vm3, %v1228_v7  ;;  %v1788_v7 = vld [vmem:[#allocation5 + $0x18] sm:$0xff] }
 0x221   :  { %4132 = vmatprep.subr.mxu0 %v4606_v12  ;;  %4143 = vmatprep.subr.mxu1 %v4606_v12 }
 0x222   :  { %4133 = vmatpush3.msra.mxu0 %v4735_v14  ;;  %4144 = vmatpush3.msra.mxu1 %v4740_v15 }
 0x223   :  { %4134 = vmatprep.subr.mxu0 %v4606_v12  ;;  %4145 = vmatprep.subr.mxu1 %v4606_v12 }
 0x224   :  { %4135 = vmatpush3.msra.mxu0 %v4751_v16  ;;  %4146 = vmatpush3.msra.mxu1 %v4756_v17 }
 0x225   :  { %4136 = vmatprep.subr.mxu0 %v4606_v12  ;;  %4147 = vmatprep.subr.mxu1 %v4606_v12 }
 0x226   :  { %4137 = vmatpush3.msra.mxu0 %v4769_v18  ;;  %4148 = vmatpush3.msra.mxu1 %v4774_v19 }
 0x227   :  { %4138 = vmatprep.subr.mxu0 %v4606_v12  ;;  %4149 = vmatprep.subr.mxu1 %v4606_v12 }
 0x228   :  { %4139 = vmatpush3.msra.mxu0 %v4787_v20  ;;  %4150 = vmatpush3.msra.mxu1 %v4792_v21 }
 0x229   :  { %4140 = vmatprep.mubr.msk.f32.mxu0 %vm4607_vm2, %v4606_v12  ;;  %4151 = vmatprep.mubr.msk.f32.mxu1 %vm4607_vm2, %v4606_v12 }
 0x22a   :  { %4154 = vmatprep.subr.mxu0 %v4606_v12  ;;  %4165 = vmatprep.subr.mxu1 %v4606_v12 }
 0x2d7   :  { %v1302_v9 = vpop.f32.mrf.mxu0  ;;  %v1381_v11 = vpop.f32.mrf.mxu1 }
 0x2d8   :  { %v1306_v13 = vadd.f32 %v1302_v9, %v1232_v8  ;;  %v1385_v30 = vadd.f32 %v1381_v11, %v1314_v10  ;;  %v1714_v11 = vld [vmem:[#allocation4 + $0x18] sm:$0xff] }
 0x2d9   :  { %v4098_v31 = vpop.f32.mrf.mxu0  ;;  %v4109_v32 = vpop.f32.mrf.mxu1 }
 0x2da   :  { %v3643_v33 = vmul.f32 -1.442695, %v1306_v13  ;;  %v3645_v34 = vmul.f32 -1.442695, %v1385_v30 }
 0x2dc   :  { %4472 = vpow2.f32 %v3643_v33 }
 0x2dd   :  { %4474 = vpow2.f32 %v3645_v34 }
 0x2e0   :  { %v1460_v35 = vpop.f32.mrf.mxu0  ;;  %v1534_v36 = vpop.f32.mrf.mxu1 }
 0x2e1   :  { %v1538_v38 = vadd.f32 %v1534_v36, %v1467_v37  ;;  %v1464_v43 = vadd.f32 %v1460_v35, %v1393_v41 }
 0x2e2   :  { %v4120_v39 = vpop.f32.mrf.mxu0  ;;  %v4131_v40 = vpop.f32.mrf.mxu1 }
 0x2e3   :  { %v3648_v42 = vmul.f32 -1.442695, %v1538_v38 }
 0x2e5   :  { %4476 = vpow2.f32 %v3648_v42 }
 0x2e6   :  { %4478 = vtanh.f32 %v1464_v43 }
 0x2e9   :  { %v4473_v44 = vpop.eup %4472 }
 0x2ea   :  { %v4475_v45 = vpop.eup %4474  ;;  %v1310_v46 = vadd.f32 1.0, %v4473_v44 }
 0x2eb   :  { %v1389_v47 = vadd.f32 1.0, %v4475_v45 }
 0x2ec   :  { %4480 = vrcp.f32 %v1310_v46  ;;  %v2035_v46 = vld [vmem:[#allocation4 + $0x20] sm:$0xff] }
 0x2ed   :  { %4482 = vrcp.f32 %v1389_v47 }
 0x2f2   :  { %v4477_v48 = vpop.eup %4476 }
 0x2f3   :  { %v4479_v49 = vpop.eup %4478  ;;  %v1542_v53 = vadd.f32 1.0, %v4477_v48 }
 0x2f5   :  { %4484 = vrcp.f32 %v1542_v53 }
 0x2f9   :  { %v4481_v50 = vpop.eup %4480 }
 0x2fa   :  { %v4483_v51 = vpop.eup %4482  ;;  %v1546_v52 = vmul.f32 %v4481_v50, %v4479_v49 }
 0x2fb   :  { %v1545_v54 = vmul.f32 %v4483_v51, %v4983_v4 }
 0x2fd   :  { %v5032_v55 = vadd.f32 %v1546_v52, %v1545_v54 }
 0x2ff   :  { %4486 = vtanh.f32 %v5032_v55 }
 0x302   :  { %v4485_v56 = vpop.eup %4484 }
 0x30c   :  { %v4487_v57 = vpop.eup %4486 }
 0x30d   :  { %v1549_v58 = vmul.f32 %v4487_v57, %v4485_v56 }
 0x30f   :  { %1551 = vst.msk [vmem:[#allocation6 + $0x10] sm:$0xff] %vm188_vm3, %v1549_v58  ;;  %4141 = vmatmul.mubr.msk.f32.vlgmr.msra.gmra.mxu0 %vm188_vm3, %v1549_v58  ;;  %4152 = vmatmul.mubr.msk.f32.vlgmr.msra.gmra.mxu1 %vm188_vm3, %v1549_v58 }
 0x310   :  { %4155 = vmatpush3.msra.mxu0 %v4807_v22  ;;  %4166 = vmatpush3.msra.mxu1 %v4812_v23 }
 0x311   :  { %4156 = vmatprep.subr.mxu0 %v4606_v12  ;;  %4167 = vmatprep.subr.mxu1 %v4606_v12 }
 0x312   :  { %4157 = vmatpush3.msra.mxu0 %v4821_v24  ;;  %4168 = vmatpush3.msra.mxu1 %v4826_v25 }
 0x313   :  { %4158 = vmatprep.subr.mxu0 %v4606_v12  ;;  %4169 = vmatprep.subr.mxu1 %v4606_v12 }
 0x314   :  { %4159 = vmatpush3.msra.mxu0 %v4835_v26  ;;  %4170 = vmatpush3.msra.mxu1 %v4840_v27 }
 0x315   :  { %4160 = vmatprep.subr.mxu0 %v4606_v12  ;;  %4171 = vmatprep.subr.mxu1 %v4606_v12 }
 0x316   :  { %4161 = vmatpush3.msra.mxu0 %v4849_v28  ;;  %4162 = vmatprep.mubr.msk.f32.mxu0 %vm4607_vm2, %v4606_v12 }
 0x317   :  { %4172 = vmatpush3.msra.mxu1 %v4856_v29  ;;  %4173 = vmatprep.mubr.msk.f32.mxu1 %vm4607_vm2, %v4606_v12 }
 0x318   :  { %4163 = vmatmul.mubr.msk.f32.vlgmr.msra.gmra.mxu0 %vm188_vm3, %v1549_v58  ;;  %4174 = vmatmul.mubr.msk.f32.vlgmr.msra.gmra.mxu1 %vm188_vm3, %v1549_v58 }
 0x319   :  { %4176 = vmatprep.subr.mxu0 %v4606_v12  ;;  %4187 = vmatprep.subr.mxu1 %v4606_v12 }
 0x31a   :  { %4177 = vmatpush3.msra.mxu0 %v4735_v14  ;;  %4188 = vmatpush3.msra.mxu1 %v4740_v15 }
 0x31b   :  { %4178 = vmatprep.subr.mxu0 %v4606_v12  ;;  %4189 = vmatprep.subr.mxu1 %v4606_v12 }
 0x31c   :  { %4179 = vmatpush3.msra.mxu0 %v4751_v16  ;;  %4190 = vmatpush3.msra.mxu1 %v4756_v17 }
 0x31d   :  { %4180 = vmatprep.subr.mxu0 %v4606_v12  ;;  %4191 = vmatprep.subr.mxu1 %v4606_v12 }
 0x31e   :  { %4181 = vmatpush3.msra.mxu0 %v4769_v18  ;;  %4192 = vmatpush3.msra.mxu1 %v4774_v19 }
 0x31f   :  { %4182 = vmatprep.subr.mxu0 %v4606_v12  ;;  %4193 = vmatprep.subr.mxu1 %v4606_v12 }
 0x320   :  { %4183 = vmatpush3.msra.mxu0 %v4787_v20  ;;  %4194 = vmatpush3.msra.mxu1 %v4792_v21 }
 0x321   :  { %4184 = vmatprep.mubr.msk.f32.mxu0 %vm4607_vm2, %v4606_v12  ;;  %4195 = vmatprep.mubr.msk.f32.mxu1 %vm4607_vm2, %v4606_v12 }
 0x322   :  { %4198 = vmatprep.subr.mxu0 %v4606_v12  ;;  %4209 = vmatprep.subr.mxu1 %v4606_v12 }
 0x3cf   :  { %v1623_v60 = vpop.f32.mrf.mxu0  ;;  %v1702_v0 = vpop.f32.mrf.mxu1 }
 0x3d0   :  { %v1627_v62 = vadd.f32 %v1623_v60, %v1553_v59  ;;  %v1706_v63 = vadd.f32 %v1702_v0, %v1635_v61 }
 0x3d1   :  { %v4142_v1 = vpop.f32.mrf.mxu0  ;;  %v4153_v2 = vpop.f32.mrf.mxu1 }
 0x3d2   :  { %v3650_v3 = vmul.f32 -1.442695, %v1627_v62  ;;  %v3652_v4 = vmul.f32 -1.442695, %v1706_v63  ;;  %v5139_v63 = vld [vmem:[%s5438_s3 + $0x58] sm:$0xff]  ;;  %v5153_v2 = vld [vmem:[%s5438_s3 + $0x50] sm:$0xff] }
 0x3d3   :  { %v5145_v1 = vld [vmem:[%s5438_s3 + $0x78] sm:$0xff] }
 0x3d4   :  { %4488 = vpow2.f32 %v3650_v3  ;;  %v5159_v3 = vld [vmem:[%s5438_s3 + $0x70] sm:$0xff] }
 0x3d5   :  { %4490 = vpow2.f32 %v3652_v4  ;;  %v5167_v4 = vld [vmem:[%s5438_s3 + $0x48] sm:$0xff] }
 0x3d8   :  { %v1781_v5 = vpop.f32.mrf.mxu0  ;;  %v1855_v6 = vpop.f32.mrf.mxu1 }
 0x3d9   :  { %v1859_v8 = vadd.f32 %v1855_v6, %v1788_v7  ;;  %v1785_v30 = vadd.f32 %v1781_v5, %v1714_v11  ;;  %v5173_v5 = vld [vmem:[%s5438_s3 + $0x68] sm:$0xff]  ;;  %v5181_v6 = vld [vmem:[%s5438_s3 + $0x40] sm:$0xff]  ;;  %v5221_v11 = vld [vmem:[%s5438_s3 + $0x30] sm:$0xff] }
 0x3da   :  { %v4164_v9 = vpop.f32.mrf.mxu0  ;;  %v4175_v10 = vpop.f32.mrf.mxu1  ;;  %v5189_v7 = vld [vmem:[%s5438_s3 + $0x60] sm:$0xff] }
 0x3db   :  { %v3655_v13 = vmul.f32 -1.442695, %v1859_v8  ;;  %v5201_v8 = vld [vmem:[%s5438_s3 + $0x18] sm:$0xff]  ;;  %v5215_v10 = vld [vmem:[%s5438_s3 + $0x10] sm:$0xff] }
 0x3dc   :  { %v5207_v9 = vld [vmem:[%s5438_s3 + $0x38] sm:$0xff] }
 0x3dd   :  { %4492 = vpow2.f32 %v3655_v13  ;;  %v5229_v13 = vld [vmem:[%s5438_s3 + $0x8] sm:$0xff] }
 0x3de   :  { %4494 = vtanh.f32 %v1785_v30  ;;  %v5235_v30 = vld [vmem:[%s5438_s3 + $0x28] sm:$0xff] }
 0x3e1   :  { %v4489_v31 = vpop.eup %4488 }
 0x3e2   :  { %v4491_v32 = vpop.eup %4490  ;;  %v1631_v33 = vadd.f32 1.0, %v4489_v31  ;;  %v5243_v31 = vld [vmem:[%s5438_s3] sm:$0xff] }
 0x3e3   :  { %v1710_v34 = vadd.f32 1.0, %v4491_v32  ;;  %v5249_v32 = vld [vmem:[%s5438_s3 + $0x20] sm:$0xff] }
 0x3e4   :  { %4496 = vrcp.f32 %v1631_v33  ;;  %v2195_v33 = vld [vmem:[#allocation2 + $0x28] sm:$0xff] }
 0x3e5   :  { %4498 = vrcp.f32 %v1710_v34 }
 0x3ea   :  { %v4493_v35 = vpop.eup %4492 }
 0x3eb   :  { %v4495_v36 = vpop.eup %4494  ;;  %v1863_v40 = vadd.f32 1.0, %v4493_v35  ;;  %v2277_v35 = vld [vmem:[#allocation3 + $0x28] sm:$0xff] }
 0x3ed   :  { %4500 = vrcp.f32 %v1863_v40 }
 0x3f1   :  { %v4497_v37 = vpop.eup %4496 }
 0x3f2   :  { %v4499_v38 = vpop.eup %4498  ;;  %v1867_v39 = vmul.f32 %v4497_v37, %v4495_v36 }
 0x3f3   :  { %v1866_v41 = vmul.f32 %v4499_v38, %v5032_v55 }
 0x3f5   :  { %v5081_v42 = vadd.f32 %v1867_v39, %v1866_v41 }
 0x3f7   :  { %4502 = vtanh.f32 %v5081_v42 }
 0x3fa   :  { %v4501_v43 = vpop.eup %4500 }
 0x404   :  { %v4503_v44 = vpop.eup %4502 }
 0x405   :  { %v1870_v45 = vmul.f32 %v4503_v44, %v4501_v43 }
 0x407   :  { %1872 = vst.msk [vmem:[#allocation6 + $0x18] sm:$0xff] %vm188_vm3, %v1870_v45  ;;  %4185 = vmatmul.mubr.msk.f32.vlgmr.msra.gmra.mxu0 %vm188_vm3, %v1870_v45  ;;  %4196 = vmatmul.mubr.msk.f32.vlgmr.msra.gmra.mxu1 %vm188_vm3, %v1870_v45 }
 0x408   :  { %4199 = vmatpush3.msra.mxu0 %v4807_v22  ;;  %4210 = vmatpush3.msra.mxu1 %v4812_v23 }
 0x409   :  { %4200 = vmatprep.subr.mxu0 %v4606_v12  ;;  %4211 = vmatprep.subr.mxu1 %v4606_v12 }
 0x40a   :  { %4201 = vmatpush3.msra.mxu0 %v4821_v24  ;;  %4212 = vmatpush3.msra.mxu1 %v4826_v25 }
 0x40b   :  { %4202 = vmatprep.subr.mxu0 %v4606_v12  ;;  %4213 = vmatprep.subr.mxu1 %v4606_v12 }
 0x40c   :  { %4203 = vmatpush3.msra.mxu0 %v4835_v26  ;;  %4214 = vmatpush3.msra.mxu1 %v4840_v27  ;;  %v2109_v26 = vld [vmem:[#allocation5 + $0x20] sm:$0xff] }
 0x40d   :  { %4204 = vmatprep.subr.mxu0 %v4606_v12  ;;  %4215 = vmatprep.subr.mxu1 %v4606_v12 }
 0x40e   :  { %4205 = vmatpush3.msra.mxu0 %v4849_v28  ;;  %4206 = vmatprep.mubr.msk.f32.mxu0 %vm4607_vm2, %v4606_v12 }
 0x40f   :  { %4216 = vmatpush3.msra.mxu1 %v4856_v29  ;;  %4217 = vmatprep.mubr.msk.f32.mxu1 %vm4607_vm2, %v4606_v12 }
 0x410   :  { %4207 = vmatmul.mubr.msk.f32.vlgmr.msra.gmra.mxu0 %vm188_vm3, %v1870_v45  ;;  %4218 = vmatmul.mubr.msk.f32.vlgmr.msra.gmra.mxu1 %vm188_vm3, %v1870_v45  ;;  %v2430_v45 = vld [vmem:[#allocation5 + $0x28] sm:$0xff] }
 0x411   :  { %4220 = vmatprep.subr.mxu0 %v4606_v12  ;;  %4231 = vmatprep.subr.mxu1 %v4606_v12 }
 0x412   :  { %4221 = vmatpush3.msra.mxu0 %v4735_v14  ;;  %4232 = vmatpush3.msra.mxu1 %v4740_v15  ;;  %v1874_v14 = vld [vmem:[#allocation2 + $0x20] sm:$0xff] }
 0x413   :  { %4222 = vmatprep.subr.mxu0 %v4606_v12  ;;  %4233 = vmatprep.subr.mxu1 %v4606_v12 }
 0x414   :  { %4223 = vmatpush3.msra.mxu0 %v4751_v16  ;;  %4234 = vmatpush3.msra.mxu1 %v4756_v17  ;;  %v1956_v16 = vld [vmem:[#allocation3 + $0x20] sm:$0xff] }
 0x415   :  { %4224 = vmatprep.subr.mxu0 %v4606_v12  ;;  %4235 = vmatprep.subr.mxu1 %v4606_v12 }
 0x416   :  { %4225 = vmatpush3.msra.mxu0 %v4769_v18  ;;  %4236 = vmatpush3.msra.mxu1 %v4774_v19 }
 0x417   :  { %4226 = vmatprep.subr.mxu0 %v4606_v12  ;;  %4237 = vmatprep.subr.mxu1 %v4606_v12 }
 0x418   :  { %4227 = vmatpush3.msra.mxu0 %v4787_v20  ;;  %4238 = vmatpush3.msra.mxu1 %v4792_v21 }
 0x419   :  { %4228 = vmatprep.mubr.msk.f32.mxu0 %vm4607_vm2, %v4606_v12  ;;  %4239 = vmatprep.mubr.msk.f32.mxu1 %vm4607_vm2, %v4606_v12 }
 0x41a   :  { %4242 = vmatprep.subr.mxu0 %v4606_v12  ;;  %4253 = vmatprep.subr.mxu1 %v4606_v12 }
 0x4c7   :  { %v1944_v15 = vpop.f32.mrf.mxu0  ;;  %v2023_v17 = vpop.f32.mrf.mxu1 }
 0x4c8   :  { %v1948_v18 = vadd.f32 %v1944_v15, %v1874_v14  ;;  %v2027_v19 = vadd.f32 %v2023_v17, %v1956_v16  ;;  %v2356_v17 = vld [vmem:[#allocation4 + $0x28] sm:$0xff] }
 0x4c9   :  { %v4186_v22 = vpop.f32.mrf.mxu0  ;;  %v4197_v20 = vpop.f32.mrf.mxu1 }
 0x4ca   :  { %v3657_v23 = vmul.f32 -1.442695, %v1948_v18  ;;  %v3659_v21 = vmul.f32 -1.442695, %v2027_v19 }
 0x4cc   :  { %4504 = vpow2.f32 %v3657_v23 }
 0x4cd   :  { %4506 = vpow2.f32 %v3659_v21 }
 0x4d0   :  { %v2102_v24 = vpop.f32.mrf.mxu0  ;;  %v2176_v25 = vpop.f32.mrf.mxu1 }
 0x4d1   :  { %v2180_v27 = vadd.f32 %v2176_v25, %v2109_v26  ;;  %v2106_v48 = vadd.f32 %v2102_v24, %v2035_v46 }
 0x4d2   :  { %v4208_v28 = vpop.f32.mrf.mxu0  ;;  %v4219_v29 = vpop.f32.mrf.mxu1 }
 0x4d3   :  { %v3662_v47 = vmul.f32 -1.442695, %v2180_v27 }
 0x4d5   :  { %4508 = vpow2.f32 %v3662_v47 }
 0x4d6   :  { %4510 = vtanh.f32 %v2106_v48 }
 0x4d9   :  { %v4505_v49 = vpop.eup %4504 }
 0x4da   :  { %v4507_v50 = vpop.eup %4506  ;;  %v1952_v51 = vadd.f32 1.0, %v4505_v49 }
 0x4db   :  { %v2031_v52 = vadd.f32 1.0, %v4507_v50 }
 0x4dc   :  { %4512 = vrcp.f32 %v1952_v51  ;;  %v2516_v51 = vld [vmem:[#allocation2 + $0x30] sm:$0xff] }
 0x4dd   :  { %4514 = vrcp.f32 %v2031_v52 }
 0x4e2   :  { %v4509_v53 = vpop.eup %4508 }
 0x4e3   :  { %v4511_v54 = vpop.eup %4510  ;;  %v2184_v58 = vadd.f32 1.0, %v4509_v53  ;;  %v2598_v53 = vld [vmem:[#allocation3 + $0x30] sm:$0xff] }
 0x4e5   :  { %4516 = vrcp.f32 %v2184_v58 }
 0x4e9   :  { %v4513_v55 = vpop.eup %4512 }
 0x4ea   :  { %v4515_v56 = vpop.eup %4514  ;;  %v2188_v57 = vmul.f32 %v4513_v55, %v4511_v54 }
 0x4eb   :  { %v2187_v59 = vmul.f32 %v4515_v56, %v5081_v42 }
 0x4ed   :  { %v5130_v60 = vadd.f32 %v2188_v57, %v2187_v59 }
 0x4ef   :  { %4518 = vtanh.f32 %v5130_v60 }
 0x4f2   :  { %v4517_v61 = vpop.eup %4516 }
 0x4fc   :  { %v4519_v0 = vpop.eup %4518 }
 0x4fd   :  { %v2191_v62 = vmul.f32 %v4519_v0, %v4517_v61 }
 0x4ff   :  { %2193 = vst.msk [vmem:[#allocation6 + $0x20] sm:$0xff] %vm188_vm3, %v2191_v62  ;;  %4229 = vmatmul.mubr.msk.f32.vlgmr.msra.gmra.mxu0 %vm188_vm3, %v2191_v62  ;;  %4240 = vmatmul.mubr.msk.f32.vlgmr.msra.gmra.mxu1 %vm188_vm3, %v2191_v62 }
 0x500   :  { %4243 = vmatpush3.msra.mxu0 %v5139_v63  ;;  %4254 = vmatpush3.msra.mxu1 %v5145_v1 }
 0x501   :  { %4244 = vmatprep.subr.mxu0 %v4606_v12  ;;  %4255 = vmatprep.subr.mxu1 %v4606_v12 }
 0x502   :  { %4245 = vmatpush3.msra.mxu0 %v5153_v2  ;;  %4256 = vmatpush3.msra.mxu1 %v5159_v3 }
 0x503   :  { %4246 = vmatprep.subr.mxu0 %v4606_v12  ;;  %4257 = vmatprep.subr.mxu1 %v4606_v12 }
 0x504   :  { %4247 = vmatpush3.msra.mxu0 %v5167_v4  ;;  %4258 = vmatpush3.msra.mxu1 %v5173_v5 }
 0x505   :  { %4248 = vmatprep.subr.mxu0 %v4606_v12  ;;  %4259 = vmatprep.subr.mxu1 %v4606_v12 }
 0x506   :  { %4249 = vmatpush3.msra.mxu0 %v5181_v6  ;;  %4250 = vmatprep.mubr.msk.f32.mxu0 %vm4607_vm2, %v4606_v12 }
 0x507   :  { %4260 = vmatpush3.msra.mxu1 %v5189_v7  ;;  %4261 = vmatprep.mubr.msk.f32.mxu1 %vm4607_vm2, %v4606_v12 }
 0x508   :  { %4251 = vmatmul.mubr.msk.f32.vlgmr.msra.gmra.mxu0 %vm188_vm3, %v2191_v62  ;;  %4262 = vmatmul.mubr.msk.f32.vlgmr.msra.gmra.mxu1 %vm188_vm3, %v2191_v62  ;;  %v2751_v62 = vld [vmem:[#allocation5 + $0x30] sm:$0xff] }
 0x509   :  { %4264 = vmatprep.subr.mxu0 %v4606_v12  ;;  %4275 = vmatprep.subr.mxu1 %v4606_v12 }
 0x50a   :  { %4265 = vmatpush3.msra.mxu0 %v5201_v8  ;;  %4276 = vmatpush3.msra.mxu1 %v5207_v9 }
 0x50b   :  { %4266 = vmatprep.subr.mxu0 %v4606_v12  ;;  %4277 = vmatprep.subr.mxu1 %v4606_v12 }
 0x50c   :  { %4267 = vmatpush3.msra.mxu0 %v5215_v10  ;;  %4278 = vmatpush3.msra.mxu1 %v5221_v11 }
 0x50d   :  { %4268 = vmatprep.subr.mxu0 %v4606_v12  ;;  %4279 = vmatprep.subr.mxu1 %v4606_v12 }
 0x50e   :  { %4269 = vmatpush3.msra.mxu0 %v5229_v13  ;;  %4280 = vmatpush3.msra.mxu1 %v5235_v30 }
 0x50f   :  { %4270 = vmatprep.subr.mxu0 %v4606_v12  ;;  %4281 = vmatprep.subr.mxu1 %v4606_v12 }
 0x510   :  { %4271 = vmatpush3.msra.mxu0 %v5243_v31  ;;  %4282 = vmatpush3.msra.mxu1 %v5249_v32 }
 0x511   :  { %4272 = vmatprep.mubr.msk.f32.mxu0 %vm4607_vm2, %v4606_v12  ;;  %4283 = vmatprep.mubr.msk.f32.mxu1 %vm4607_vm2, %v4606_v12 }
 0x512   :  { %4286 = vmatprep.subr.mxu0 %v4606_v12  ;;  %4297 = vmatprep.subr.mxu1 %v4606_v12 }
 0x5bf   :  { %v2265_v34 = vpop.f32.mrf.mxu0  ;;  %v2344_v36 = vpop.f32.mrf.mxu1 }
 0x5c0   :  { %v2269_v37 = vadd.f32 %v2265_v34, %v2195_v33  ;;  %v2348_v38 = vadd.f32 %v2344_v36, %v2277_v35 }
 0x5c1   :  { %v4230_v39 = vpop.f32.mrf.mxu0  ;;  %v4241_v40 = vpop.f32.mrf.mxu1 }
 0x5c2   :  { %v3664_v41 = vmul.f32 -1.442695, %v2269_v37  ;;  %v3666_v42 = vmul.f32 -1.442695, %v2348_v38 }
 0x5c4   :  { %4520 = vpow2.f32 %v3664_v41 }
 0x5c5   :  { %4522 = vpow2.f32 %v3666_v42 }
 0x5c8   :  { %v2423_v43 = vpop.f32.mrf.mxu0  ;;  %v2497_v44 = vpop.f32.mrf.mxu1 }
 0x5c9   :  { %v2501_v14 = vadd.f32 %v2497_v44, %v2430_v45  ;;  %v2427_v19 = vadd.f32 %v2423_v43, %v2356_v17  ;;  %v3159_v17 = vld [vmem:[#allocation6 + $0x10] sm:$0xff] }
 0x5ca   :  { %v4252_v15 = vpop.f32.mrf.mxu0  ;;  %v4263_v16 = vpop.f32.mrf.mxu1 }
 0x5cb   :  { %v3669_v18 = vmul.f32 -1.442695, %v2501_v14  ;;  %v3325_v14 = vld [vmem:[%s5441_s6 + $0x60] sm:$0xff]  ;;  %v3324_v15 = vld [vmem:[%s5441_s6 + $0x58] sm:$0xff]  ;;  %v3158_v16 = vld [vmem:[#allocation6 + $0x8] sm:$0xff] }
 0x5cd   :  { %4524 = vpow2.f32 %v3669_v18  ;;  %v3160_v18 = vld [vmem:[#allocation6 + $0x18] sm:$0xff] }
 0x5ce   :  { %4526 = vtanh.f32 %v2427_v19  ;;  %v3161_v19 = vld [vmem:[#allocation6 + $0x20] sm:$0xff] }
 0x5d1   :  { %v4521_v22 = vpop.eup %4520 }
 0x5d2   :  { %v4523_v20 = vpop.eup %4522  ;;  %v2273_v23 = vadd.f32 1.0, %v4521_v22 }
 0x5d3   :  { %v2352_v21 = vadd.f32 1.0, %v4523_v20 }
 0x5d4   :  { %4528 = vrcp.f32 %v2273_v23  ;;  %v3323_v23 = vld [vmem:[%s5441_s6 + $0x50] sm:$0xff] }
 0x5d5   :  { %4530 = vrcp.f32 %v2352_v21  ;;  %v3322_v21 = vld [vmem:[%s5441_s6 + $0x48] sm:$0xff] }
 0x5da   :  { %v4525_v24 = vpop.eup %4524 }
 0x5db   :  { %v4527_v25 = vpop.eup %4526  ;;  %v2505_v29 = vadd.f32 1.0, %v4525_v24  ;;  %v3321_v24 = vld [vmem:[%s5441_s6 + $0x40] sm:$0xff] }
 0x5dd   :  { %4532 = vrcp.f32 %v2505_v29  ;;  %v3316_v29 = vld [vmem:[%s5441_s6 + $0x18] sm:$0xff] }
 0x5e1   :  { %v4529_v26 = vpop.eup %4528 }
 0x5e2   :  { %v4531_v27 = vpop.eup %4530  ;;  %v2509_v28 = vmul.f32 %v4529_v26, %v4527_v25  ;;  %v3320_v25 = vld [vmem:[%s5441_s6 + $0x38] sm:$0xff]  ;;  %v3319_v26 = vld [vmem:[%s5441_s6 + $0x30] sm:$0xff] }
 0x5e3   :  { %v2508_v46 = vmul.f32 %v4531_v27, %v5130_v60  ;;  %v3318_v27 = vld [vmem:[%s5441_s6 + $0x28] sm:$0xff] }
 0x5e5   :  { %v5259_v47 = vadd.f32 %v2509_v28, %v2508_v46  ;;  %v3317_v28 = vld [vmem:[%s5441_s6 + $0x20] sm:$0xff]  ;;  %v3315_v46 = vld [vmem:[%s5441_s6 + $0x10] sm:$0xff] }
 0x5e7   :  { %4534 = vtanh.f32 %v5259_v47 }
 0x5ea   :  { %v4533_v48 = vpop.eup %4532 }
 0x5f4   :  { %v4535_v49 = vpop.eup %4534 }
 0x5f5   :  { %v2512_v50 = vmul.f32 %v4535_v49, %v4533_v48  ;;  %v3313_v48 = vld [vmem:[%s5441_s6] sm:$0xff]  ;;  %v2837_v49 = vld [vmem:[#allocation2 + $0x38] sm:$0xff] }
 0x5f7   :  { %2514 = vst.msk [vmem:[#allocation6 + $0x28] sm:$0xff] %vm188_vm3, %v2512_v50  ;;  %4273 = vmatmul.mubr.msk.f32.vlgmr.msra.gmra.mxu0 %vm188_vm3, %v2512_v50  ;;  %4284 = vmatmul.mubr.msk.f32.vlgmr.msra.gmra.mxu1 %vm188_vm3, %v2512_v50 }
 0x5f8   :  { %4287 = vmatpush3.msra.mxu0 %v5139_v63  ;;  %4298 = vmatpush3.msra.mxu1 %v5145_v1 }
 0x5f9   :  { %4288 = vmatprep.subr.mxu0 %v4606_v12  ;;  %4299 = vmatprep.subr.mxu1 %v4606_v12 }
 0x5fa   :  { %4289 = vmatpush3.msra.mxu0 %v5153_v2  ;;  %4300 = vmatpush3.msra.mxu1 %v5159_v3 }
 0x5fb   :  { %4290 = vmatprep.subr.mxu0 %v4606_v12  ;;  %4301 = vmatprep.subr.mxu1 %v4606_v12 }
 0x5fc   :  { %4291 = vmatpush3.msra.mxu0 %v5167_v4  ;;  %4302 = vmatpush3.msra.mxu1 %v5173_v5 }
 0x5fd   :  { %4292 = vmatprep.subr.mxu0 %v4606_v12  ;;  %4303 = vmatprep.subr.mxu1 %v4606_v12 }
 0x5fe   :  { %4293 = vmatpush3.msra.mxu0 %v5181_v6  ;;  %4294 = vmatprep.mubr.msk.f32.mxu0 %vm4607_vm2, %v4606_v12  ;;  %v3162_v22 = vld [vmem:[#allocation6 + $0x28] sm:$0xff] }
 0x5ff   :  { %4304 = vmatpush3.msra.mxu1 %v5189_v7  ;;  %4305 = vmatprep.mubr.msk.f32.mxu1 %vm4607_vm2, %v4606_v12 }
 0x600   :  { %4295 = vmatmul.mubr.msk.f32.vlgmr.msra.gmra.mxu0 %vm188_vm3, %v2512_v50  ;;  %4306 = vmatmul.mubr.msk.f32.vlgmr.msra.gmra.mxu1 %vm188_vm3, %v2512_v50 }
 0x601   :  { %4308 = vmatprep.subr.mxu0 %v4606_v12  ;;  %4319 = vmatprep.subr.mxu1 %v4606_v12 }
 0x602   :  { %4309 = vmatpush3.msra.mxu0 %v5201_v8  ;;  %4320 = vmatpush3.msra.mxu1 %v5207_v9 }
 0x603   :  { %4310 = vmatprep.subr.mxu0 %v4606_v12  ;;  %4321 = vmatprep.subr.mxu1 %v4606_v12 }
 0x604   :  { %4311 = vmatpush3.msra.mxu0 %v5215_v10  ;;  %4322 = vmatpush3.msra.mxu1 %v5221_v11  ;;  %v2677_v11 = vld [vmem:[#allocation4 + $0x30] sm:$0xff] }
 0x605   :  { %4312 = vmatprep.subr.mxu0 %v4606_v12  ;;  %4323 = vmatprep.subr.mxu1 %v4606_v12 }
 0x606   :  { %4313 = vmatpush3.msra.mxu0 %v5229_v13  ;;  %4324 = vmatpush3.msra.mxu1 %v5235_v30 }
 0x607   :  { %4314 = vmatprep.subr.mxu0 %v4606_v12  ;;  %4325 = vmatprep.subr.mxu1 %v4606_v12 }
 0x608   :  { %4315 = vmatpush3.msra.mxu0 %v5243_v31  ;;  %4326 = vmatpush3.msra.mxu1 %v5249_v32 }
 0x609   :  { %4316 = vmatprep.mubr.msk.f32.mxu0 %vm4607_vm2, %v4606_v12  ;;  %4327 = vmatprep.mubr.msk.f32.mxu1 %vm4607_vm2, %v4606_v12 }
 0x60a   :  { %4330 = vmatprep.subr.mxu0 %v4606_v12  ;;  %4341 = vmatprep.subr.mxu1 %v4606_v12 }
 0x6b7   :  { %v2586_v52 = vpop.f32.mrf.mxu0  ;;  %v2665_v54 = vpop.f32.mrf.mxu1 }
 0x6b8   :  { %v2590_v55 = vadd.f32 %v2586_v52, %v2516_v51  ;;  %v2669_v56 = vadd.f32 %v2665_v54, %v2598_v53  ;;  %v2919_v51 = vld [vmem:[#allocation3 + $0x38] sm:$0xff] }
 0x6b9   :  { %v4274_v57 = vpop.f32.mrf.mxu0  ;;  %v4285_v58 = vpop.f32.mrf.mxu1 }
 0x6ba   :  { %v3671_v59 = vmul.f32 -1.442695, %v2590_v55  ;;  %v3673_v60 = vmul.f32 -1.442695, %v2669_v56 }
 0x6bc   :  { %4536 = vpow2.f32 %v3671_v59 }
 0x6bd   :  { %4538 = vpow2.f32 %v3673_v60 }
 0x6c0   :  { %v2744_v61 = vpop.f32.mrf.mxu0  ;;  %v2818_v0 = vpop.f32.mrf.mxu1 }
 0x6c1   :  { %v2822_v8 = vadd.f32 %v2818_v0, %v2751_v62  ;;  %v2748_v30 = vadd.f32 %v2744_v61, %v2677_v11  ;;  %v3072_v61 = vld [vmem:[#allocation5 + $0x38] sm:$0xff] }
 0x6c2   :  { %v4296_v9 = vpop.f32.mrf.mxu0  ;;  %v4307_v10 = vpop.f32.mrf.mxu1 }
 0x6c3   :  { %v3676_v13 = vmul.f32 -1.442695, %v2822_v8  ;;  %v2998_v9 = vld [vmem:[#allocation4 + $0x38] sm:$0xff] }
 0x6c5   :  { %4540 = vpow2.f32 %v3676_v13  ;;  %v3684_v13 = vld [vmem:[%s5440_s5] ss:$0 sm:$0xff] }
 0x6c6   :  { %4542 = vtanh.f32 %v2748_v30 }
 0x6c9   :  { %v4537_v31 = vpop.eup %4536 }
 0x6ca   :  { %v4539_v32 = vpop.eup %4538  ;;  %v2594_v33 = vadd.f32 1.0, %v4537_v31 }
 0x6cb   :  { %v2673_v34 = vadd.f32 1.0, %v4539_v32 }
 0x6cc   :  { %4544 = vrcp.f32 %v2594_v33 }
 0x6cd   :  { %4546 = vrcp.f32 %v2673_v34 }
 0x6d2   :  { %v4541_v35 = vpop.eup %4540 }
 0x6d3   :  { %v4543_v36 = vpop.eup %4542  ;;  %v2826_v40 = vadd.f32 1.0, %v4541_v35 }
 0x6d5   :  { %4548 = vrcp.f32 %v2826_v40 }
 0x6d9   :  { %v4545_v37 = vpop.eup %4544 }
 0x6da   :  { %v4547_v38 = vpop.eup %4546  ;;  %v2830_v39 = vmul.f32 %v4545_v37, %v4543_v36 }
 0x6db   :  { %v2829_v41 = vmul.f32 %v4547_v38, %v5259_v47  ;;  %v3314_v47 = vld [vmem:[%s5441_s6 + $0x8] sm:$0xff] }
 0x6dd   :  { %v5308_v42 = vadd.f32 %v2830_v39, %v2829_v41 }
 0x6df   :  { %4550 = vtanh.f32 %v5308_v42 }
 0x6e2   :  { %v4549_v43 = vpop.eup %4548 }
 0x6ec   :  { %v4551_v44 = vpop.eup %4550 }
 0x6ed   :  { %v2833_v45 = vmul.f32 %v4551_v44, %v4549_v43 }
 0x6ef   :  { %2835 = vst.msk [vmem:[#allocation6 + $0x30] sm:$0xff] %vm188_vm3, %v2833_v45  ;;  %4317 = vmatmul.mubr.msk.f32.vlgmr.msra.gmra.mxu0 %vm188_vm3, %v2833_v45  ;;  %4328 = vmatmul.mubr.msk.f32.vlgmr.msra.gmra.mxu1 %vm188_vm3, %v2833_v45 }
 0x6f0   :  { %4331 = vmatpush3.msra.mxu0 %v5139_v63  ;;  %4342 = vmatpush3.msra.mxu1 %v5145_v1  ;;  %v3168_v63 = vld [vmem:[%s5439_s4 + $0x18] sm:$0xff] }
 0x6f1   :  { %4332 = vmatprep.subr.mxu0 %v4606_v12  ;;  %4343 = vmatprep.subr.mxu1 %v4606_v12  ;;  %v3328_v1 = vld [vmem:[%s5441_s6 + $0x78] sm:$0xff] }
 0x6f2   :  { %4333 = vmatpush3.msra.mxu0 %v5153_v2  ;;  %4344 = vmatpush3.msra.mxu1 %v5159_v3  ;;  %v3157_v2 = vld [vmem:[#allocation6] sm:$0xff]  ;;  %v3167_v3 = vld [vmem:[%s5439_s4 + $0x10] sm:$0xff] }
 0x6f3   :  { %4334 = vmatprep.subr.mxu0 %v4606_v12  ;;  %4345 = vmatprep.subr.mxu1 %v4606_v12 }
 0x6f4   :  { %4335 = vmatpush3.msra.mxu0 %v5167_v4  ;;  %4346 = vmatpush3.msra.mxu1 %v5173_v5  ;;  %v3327_v4 = vld [vmem:[%s5441_s6 + $0x70] sm:$0xff]  ;;  %v3166_v5 = vld [vmem:[%s5439_s4 + $0x8] sm:$0xff] }
 0x6f5   :  { %4336 = vmatprep.subr.mxu0 %v4606_v12  ;;  %4347 = vmatprep.subr.mxu1 %v4606_v12 }
 0x6f6   :  { %4337 = vmatpush3.msra.mxu0 %v5181_v6  ;;  %4338 = vmatprep.mubr.msk.f32.mxu0 %vm4607_vm2, %v4606_v12  ;;  %v3326_v6 = vld [vmem:[%s5441_s6 + $0x68] sm:$0xff]  ;;  %v3163_v20 = vld [vmem:[#allocation6 + $0x30] sm:$0xff] }
 0x6f7   :  { %4348 = vmatpush3.msra.mxu1 %v5189_v7  ;;  %4349 = vmatprep.mubr.msk.f32.mxu1 %vm4607_vm2, %v4606_v12  ;;  %v3165_v7 = vld [vmem:[%s5439_s4] sm:$0xff]  ;;  %s3566_s4 = sshll.u32 %s4609_s2, 4  ;;  %s3567_s4 = int_to_ptr.vmem [resolvable:$true] %s3566_s4 }
 0x6f8   :  { %4339 = vmatmul.mubr.msk.f32.vlgmr.msra.gmra.mxu0 %vm188_vm3, %v2833_v45  ;;  %4350 = vmatmul.mubr.msk.f32.vlgmr.msra.gmra.mxu1 %vm188_vm3, %v2833_v45  ;;  %s4584_s11 = scalar_lea.vmem %s3567_s4, 16  ;;  %s4588_s12 = scalar_lea.vmem %s3567_s4, 32 }
 0x6f9   :  { %4352 = vmatprep.subr.mxu0 %v3168_v63  ;;  %4360 = vmatprep.mubr.msk.f32.mxu0 %vm188_vm3, %v3157_v2  ;;  %p4585_p0 = scmp.ne.s32.totalorder %s3567_s4, %s4584_s11  ;;  %p4589_p1 = scmp.lt.s32.totalorder %s3567_s4, %s3567_s4 }
 0x6fa   :  { %4353 = vmatpush3.msra.mxu0 %v3168_v63  ;;  %4372 = vmatprep.subr.mxu1 %v3328_v1  ;;  %p4590_p2 = scmp.lt.s32.totalorder %s4588_s12, %s4584_s11 }
 0x6fb   :  { %4354 = vmatprep.subr.mxu0 %v3167_v3  ;;  %4373 = vmatpush3.msra.mxu1 %v3328_v1 }
 0x6fc   :  { %4355 = vmatpush3.msra.mxu0 %v3167_v3  ;;  %4374 = vmatprep.subr.mxu1 %v3327_v4  ;;  %p4591_p3 = por %p4590_p2, %p4589_p1 }
 0x6fd   :  { %4356 = vmatprep.subr.mxu0 %v3166_v5  ;;  %4375 = vmatpush3.msra.mxu1 %v3327_v4 }
 0x6fe   :  { %4357 = vmatpush3.msra.mxu0 %v3166_v5  ;;  %4376 = vmatprep.subr.mxu1 %v3326_v6  ;;  %p4592_p4 = pnand %p4591_p3, %p4585_p0 }
 0x6ff   :  { %4358 = vmatprep.subr.mxu0 %v3165_v7  ;;  %4377 = vmatpush3.msra.mxu1 %v3326_v6 }
 0x700   :  { %4359 = vmatpush3.msra.mxu0 %v3165_v7  ;;  %4378 = vmatprep.subr.mxu1 %v3325_v14 }
 0x701   :  { %4361 = vmatmul.mubr.msk.f32.vlgmr.msra.gmra.mxu0 %vm188_vm3, %v3158_v16  ;;  %4379 = vmatpush3.msra.mxu1 %v3325_v14 }
 0x702   :  { %4363 = vmatprep.mubr.msk.f32.mxu0 %vm188_vm3, %v3159_v17  ;;  %4380 = vmatprep.subr.mxu1 %v3324_v15 }
 0x703   :  { %4381 = vmatpush3.msra.mxu1 %v3324_v15  ;;  %4416 = vmatprep.subr.mxu0 %v4606_v12 }
 0x704   :  { %4382 = vmatprep.subr.mxu1 %v3323_v23 }
 0x705   :  { %4364 = vmatmul.mubr.msk.f32.gmra.mxu0 %vm188_vm3, %v3160_v18  ;;  %4383 = vmatpush3.msra.mxu1 %v3323_v23 }
 0x706   :  { %4366 = vmatprep.mubr.msk.f32.mxu0 %vm188_vm3, %v3161_v19  ;;  %4384 = vmatprep.subr.mxu1 %v3322_v21 }
 0x707   :  { %4385 = vmatpush3.msra.mxu1 %v3322_v21 }
 0x708   :  { %4386 = vmatprep.subr.mxu1 %v3321_v24 }
 0x709   :  { %4367 = vmatmul.mubr.msk.f32.gmra.mxu0 %vm188_vm3, %v3162_v22  ;;  %4387 = vmatpush3.msra.mxu1 %v3321_v24 }
 0x70a   :  { %4369 = vmatprep.mubr.msk.f32.mxu0 %vm188_vm3, %v3163_v20  ;;  %4388 = vmatprep.subr.mxu1 %v3320_v25 }
 0x70b   :  { %4389 = vmatpush3.msra.mxu1 %v3320_v25 }
 0x70c   :  { %4390 = vmatprep.subr.mxu1 %v3319_v26 }
 0x70d   :  { %4391 = vmatpush3.msra.mxu1 %v3319_v26 }
 0x70e   :  { %4392 = vmatprep.subr.mxu1 %v3318_v27 }
 0x70f   :  { %4393 = vmatpush3.msra.mxu1 %v3318_v27 }
 0x710   :  { %4394 = vmatprep.subr.mxu1 %v3317_v28 }
 0x711   :  { %4395 = vmatpush3.msra.mxu1 %v3317_v28 }
 0x712   :  { %4396 = vmatprep.subr.mxu1 %v3316_v29 }
 0x713   :  { %4397 = vmatpush3.msra.mxu1 %v3316_v29 }
 0x714   :  { %4398 = vmatprep.subr.mxu1 %v3315_v46 }
 0x715   :  { %4399 = vmatpush3.msra.mxu1 %v3315_v46  ;;  %v3450_v46 = vld [vmem:[#allocation7] sm:$0x1] }
 0x716   :  { %4400 = vmatprep.subr.mxu1 %v3314_v47 }
 0x717   :  { %4401 = vmatpush3.msra.mxu1 %v3314_v47  ;;  %v4608_v47 = vmov 0  }
 0x718   :  { %4402 = vmatprep.subr.mxu1 %v3313_v48  ;;  %4439 = vset.pattern.permute.xlu0 %v4608_v47 }
 0x719   :  { %4403 = vmatpush3.msra.mxu1 %v3313_v48  ;;  %3453 = vperm.xlu0 %4439, %v3450_v46  }
 0x7af   :  { %v2907_v50 = vpop.f32.mrf.mxu0  ;;  %v2986_v52 = vpop.f32.mrf.mxu1 }
 0x7b0   :  { %v2911_v53 = vadd.f32 %v2907_v50, %v2837_v49  ;;  %v2990_v54 = vadd.f32 %v2986_v52, %v2919_v51 }
 0x7b1   :  { %v4318_v55 = vpop.f32.mrf.mxu0  ;;  %v4329_v56 = vpop.f32.mrf.mxu1 }
 0x7b2   :  { %v3678_v57 = vmul.f32 -1.442695, %v2911_v53  ;;  %v3680_v58 = vmul.f32 -1.442695, %v2990_v54  ;;  %v3693_v54 = vld [vmem:[%s5442_s7] ss:$0 sm:$0xff] }
 0x7b4   :  { %4552 = vpow2.f32 %v3678_v57 }
 0x7b5   :  { %4554 = vpow2.f32 %v3680_v58 }
 0x7b8   :  { %v3065_v59 = vpop.f32.mrf.mxu0  ;;  %v3139_v60 = vpop.f32.mrf.mxu1 }
 0x7b9   :  { %v3143_v0 = vadd.f32 %v3139_v60, %v3072_v61  ;;  %v3069_v11 = vadd.f32 %v3065_v59, %v2998_v9 }
 0x7ba   :  { %v4340_v62 = vpop.f32.mrf.mxu0  ;;  %v4351_v8 = vpop.f32.mrf.mxu1 }
 0x7bb   :  { %v3683_v10 = vmul.f32 -1.442695, %v3143_v0 }
 0x7bd   :  { %4556 = vpow2.f32 %v3683_v10 }
 0x7be   :  { %4558 = vtanh.f32 %v3069_v11 }
 0x7c1   :  { %v4553_v30 = vpop.eup %4552  ;;  %v4362_v31 = vpop.f32.mrf.mxu0 }
 0x7c2   :  { %v4555_v32 = vpop.eup %4554  ;;  %v2915_v33 = vadd.f32 1.0, %v4553_v30  ;;  %v3272_v35 = vadd.f32 %v4362_v31, %v3684_v13 }
 0x7c3   :  { %v2994_v34 = vadd.f32 1.0, %v4555_v32  ;;  %v3266_v36 = vpop.f32.mrf.mxu0 }
 0x7c4   :  { %4560 = vrcp.f32 %v2915_v33  ;;  %v3267_v37 = vadd.f32 %v3684_v13, %v3266_v36  ;;  %v3306_v40 = vmax.f32 %v3272_v35, 0.0  ;;  %v3456_v35 = vlaneseq }
 0x7c5   :  { %4562 = vrcp.f32 %v2994_v34  ;;  %v4365_v38 = vpop.f32.mrf.mxu0  ;;  %v3449_v34 = vld [vmem:[%s5443_s8] sm:$0x1] }
 0x7c6   :  { %v3305_v39 = vmax.f32 %v3267_v37, 0.0  ;;  %v3282_v41 = vadd.f32 %v4365_v38, %v3684_v13  ;;  %v3457_v36 = vshrl.u32 %v3456_v35, 7  ;;  %v3454_v38 = vpop.permute.xlu0 %3453 }
 0x7c7   :  { %v3276_v43 = vpop.f32.mrf.mxu0 }
 0x7c8   :  { %v3277_v44 = vadd.f32 %v3684_v13, %v3276_v43  ;;  %4404 = vmatprep.mubr.f32.mxu1 %v3305_v39  ;;  %v3308_v1 = vmax.f32 %v3282_v41, 0.0  ;;  %v3458_v37 = vsub.s32 0, %v3457_v36 }
 0x7c9   :  { %v4368_v45 = vpop.f32.mrf.mxu0  ;;  %4405 = vmatmul.mubr.f32.vlgmr.msra.gmra.mxu1 %v3306_v40 }
 0x7ca   :  { %v3307_v63 = vmax.f32 %v3277_v44, 0.0  ;;  %v3292_v2 = vadd.f32 %v4368_v45, %v3684_v13  ;;  %v4557_v6 = vpop.eup %4556  ;;  %v3459_v39 = vrot.slane %v3454_v38, %v3458_v37 }
 0x7cb   :  { %v3286_v3 = vpop.f32.mrf.mxu0  ;;  %v4559_v14 = vpop.eup %4558  ;;  %v3147_v18 = vadd.f32 1.0, %v4557_v6 }
 0x7cc   :  { %v3287_v4 = vadd.f32 %v3684_v13, %v3286_v3  ;;  %4407 = vmatprep.mubr.f32.mxu1 %v3307_v63  ;;  %v3310_v7 = vmax.f32 %v3292_v2, 0.0 }
 0x7cd   :  { %4408 = vmatmul.mubr.f32.gmra.mxu1 %v3308_v1  ;;  %4564 = vrcp.f32 %v3147_v18 }
 0x7ce   :  { %v3309_v5 = vmax.f32 %v3287_v4, 0.0 }
 0x7d0   :  { %4410 = vmatprep.mubr.f32.mxu1 %v3309_v5 }
 0x7d1   :  { %v4561_v15 = vpop.eup %4560  ;;  %4411 = vmatmul.mubr.f32.gmra.mxu1 %v3310_v7 }
 0x7d2   :  { %v4563_v16 = vpop.eup %4562  ;;  %v3151_v17 = vmul.f32 %v4561_v15, %v4559_v14 }
 0x7d3   :  { %v3150_v19 = vmul.f32 %v4563_v16, %v5308_v42 }
 0x7d5   :  { %v3152_v22 = vadd.f32 %v3151_v17, %v3150_v19 }
 0x7d7   :  { %4566 = vtanh.f32 %v3152_v22 }
 0x7da   :  { %v4565_v20 = vpop.eup %4564 }
 0x7e4   :  { %v4567_v23 = vpop.eup %4566 }
 0x7e5   :  { %v3154_v21 = vmul.f32 %v4567_v23, %v4565_v20 }
 0x7e7   :  { %3156 = vst.msk [vmem:[#allocation6 + $0x38] sm:$0xff] %vm188_vm3, %v3154_v21 }
 0x7ee   :  { %v3164_v24 = vld [vmem:[#allocation6 + $0x38] sm:$0xff] }
 0x7ef   :  { %4370 = vmatmul.mubr.msk.f32.gmra.mxu0 %vm188_vm3, %v3164_v24 }
 0x7f0   :  { %4432 = vmatprep.mubr.msk.f32.mxu0 %vm4607_vm2, %v4606_v12 }
 0x889   :  { %v4406_v48 = vpop.f32.mrf.mxu1 }
 0x88b   :  { %v3402_v49 = vpop.f32.mrf.mxu1 }
 0x88c   :  { %v3403_v32 = vadd.f32 %v3693_v54, %v3402_v49 }
 0x88d   :  { %v4409_v50 = vpop.f32.mrf.mxu1 }
 0x88e   :  { %v3418_v8 = vadd.f32 %v4409_v50, %v3693_v54  ;;  %v3441_v33 = vmax.f32 %v3403_v32, 0.0 }
 0x88f   :  { %v3412_v51 = vpop.f32.mrf.mxu1 }
 0x890   :  { %v3444_v10 = vmax.f32 %v3418_v8, 0.0  ;;  %v3413_v11 = vadd.f32 %v3693_v54, %v3412_v51 }
 0x891   :  { %v4412_v52 = vpop.f32.mrf.mxu1 }
 0x892   :  { %v3428_v60 = vadd.f32 %v4412_v52, %v3693_v54  ;;  %v3443_v30 = vmax.f32 %v3413_v11, 0.0 }
 0x893   :  { %v3422_v53 = vpop.f32.mrf.mxu1 }
 0x894   :  { %v3446_v0 = vmax.f32 %v3428_v60, 0.0  ;;  %v3423_v62 = vadd.f32 %v3693_v54, %v3422_v53 }
 0x896   :  { %v3445_v9 = vmax.f32 %v3423_v62, 0.0 }
 0x8af   :  { %v4371_v25 = vpop.f32.mrf.mxu0 }
 0x8b0   :  { %v3302_v26 = vadd.f32 %v4371_v25, %v3684_v13 }
 0x8b1   :  { %v3296_v27 = vpop.f32.mrf.mxu0 }
 0x8b2   :  { %v3297_v28 = vadd.f32 %v3684_v13, %v3296_v27  ;;  %v3312_v42 = vmax.f32 %v3302_v26, 0.0  ;;  %v3408_v13 = vadd.f32 %v4406_v48, %v3693_v54 }
 0x8b4   :  { %v3311_v29 = vmax.f32 %v3297_v28, 0.0  ;;  %v3442_v31 = vmax.f32 %v3408_v13, 0.0 }
 0x8b6   :  { %4413 = vmatprep.mubr.f32.mxu1 %v3311_v29 }
 0x8b7   :  { %4414 = vmatmul.mubr.f32.gmra.mxu1 %v3312_v42 }
 0x977   :  { %v4415_v55 = vpop.f32.mrf.mxu1 }
 0x978   :  { %v3438_v56 = vadd.f32 %v4415_v55, %v3693_v54 }
 0x979   :  { %v3432_v57 = vpop.f32.mrf.mxu1 }
 0x97a   :  { %v3448_v58 = vmax.f32 %v3438_v56, 0.0  ;;  %v3433_v59 = vadd.f32 %v3693_v54, %v3432_v57 }
 0x97c   :  { %4417 = vmatpush3.xpose.msk.msra.mxu0 %vm3460_vm4, %v3448_v58  ;;  %v3447_v61 = vmax.f32 %v3433_v59, 0.0 }
 0x97d   :  { %4418 = vmatprep.subr.mxu0 %v4606_v12 }
 0x980   :  { %4419 = vmatpush3.xpose.msk.msra.mxu0 %vm3460_vm4, %v3447_v61 }
 0x981   :  { %4420 = vmatprep.subr.mxu0 %v4606_v12 }
 0x984   :  { %4421 = vmatpush3.xpose.msk.msra.mxu0 %vm3460_vm4, %v3446_v0 }
 0x985   :  { %4422 = vmatprep.subr.mxu0 %v4606_v12 }
 0x988   :  { %4423 = vmatpush3.xpose.msk.msra.mxu0 %vm3460_vm4, %v3445_v9 }
 0x989   :  { %4424 = vmatprep.subr.mxu0 %v4606_v12 }
 0x98c   :  { %4425 = vmatpush3.xpose.msk.msra.mxu0 %vm3460_vm4, %v3444_v10 }
 0x98d   :  { %4426 = vmatprep.subr.mxu0 %v4606_v12 }
 0x990   :  { %4427 = vmatpush3.xpose.msk.msra.mxu0 %vm3460_vm4, %v3443_v30 }
 0x991   :  { %4428 = vmatprep.subr.mxu0 %v4606_v12 }
 0x994   :  { %4429 = vmatpush3.xpose.msk.msra.mxu0 %vm3460_vm4, %v3442_v31 }
 0x995   :  { %4430 = vmatprep.subr.mxu0 %v4606_v12 }
 0x998   :  { %4431 = vmatpush3.xpose.msk.msra.mxu0 %vm3460_vm4, %v3441_v33 }
 0x99b   :  { %4433 = vmatmul.mubr.msk.f32.vlgmr.msra.gmra.mxu0 %vm3460_vm4, %v3449_v34 }
 0xa5b   :  { %v3554_v40 = vpop.f32.mrf.mxu0 }
 0xa5c   :  { %v3555_v41 = vadd.f32 %v3554_v40, %v3459_v39 }
 0xa5d   :  { %v4434_v12 = vpop.f32.mrf.mxu0 }
 0xa5e   :  { %3559 = vst.msk [vmem:[#allocation8] sm:$0x1] %vm3558_vm5, %v3555_v41 }
 0xa5f   :  { %4595 = shalt.err (!%p4592_p4)
}
 0xa60   :  { %3569 = dma.vmem_to_hbm [thread:$0]  %s3567_s4, 16, %s5445_s10, [#allocation9]  }
 0xa61   :  { %4604 = dma.done.wait [#allocation9], 16  }
 0xa62   :  { %4605 = vsyncadd [#allocation9], 4294967280 }
 0xa63   :  { %3573 = vsyncpa [#allocation9], 1 }

</bundles_post_ra>
